<compile_context>
chip_gen: v6e
topology: v6e:2x2x1
jax: 0.10.0
libtpu: 0.0.40
codegen_flags: <defaults>
</compile_context>

<pallas_src>
import functools

import jax
import jax.numpy as jnp
from jax import lax
from jax.experimental import pallas as pl
from jax.experimental.pallas import tpu as pltpu

SMEM = pltpu.MemorySpace.SMEM


def _sigmoid(x):
    # explicit form (exp on the EUP) to avoid any lowering surprises
    return 1.0 / (1.0 + jnp.exp(-x))


# ---------------------------------------------------------------------------
# Fused kernel: all GIN layers (grid=(L,)) + node/edge attention masks +
# reg_mask reductions on the final grid step.
# ---------------------------------------------------------------------------
def fused_gin_mask_kernel(eps_ref, bias_ref,                     # SMEM scalars
                          h0_ref, row_ref, col_ref,              # resident VMEM
                          nbatch_ref, ebatch_ref, wattT_ref,
                          eemb_ref, w1_ref, b1_ref, s1_ref, t1_ref,
                          w2_ref, b2_ref, s2_ref, t2_ref,        # per-layer
                          nkey_ref, ekey_ref, gstat_ref,         # outputs
                          grow_sc, gcol_sc, h_sc):               # VMEM scratch
    l = pl.program_id(0)
    nl = pl.num_programs(0)
    n, d = h0_ref.shape
    e = row_ref.shape[0]
    g = gstat_ref.shape[1]

    # Build one-hot gather/scatter matrices ONCE (l == 0) via iota-compare on
    # the i32 index columns (no [E, N] HBM traffic, no per-layer casts), and
    # seed the carried node-feature scratch.
    @pl.when(l == 0)
    def _():
        edge_iota = lax.broadcasted_iota(jnp.int32, (e, n), 1)
        grow_sc[...] = (edge_iota == row_ref[...]).astype(jnp.float32)   # [E, N]
        gcol_sc[...] = (edge_iota == col_ref[...]).astype(jnp.float32)   # [E, N]
        h_sc[...] = h0_ref[...]

    h = h_sc[...]                                                        # [N, D]
    grow = grow_sc[...]
    gcol = gcol_sc[...]

    # --- GIN layer l --------------------------------------------------------
    # x_j = h[row] (gather source features per edge, as a matmul)
    x_j = jnp.dot(grow, h, preferred_element_type=jnp.float32)           # [E, D]
    # message = relu(x_j + edge_embedding)
    msg = jnp.maximum(x_j + eemb_ref[...], 0.0)                          # [E, D]
    # scatter_add into target nodes: gcol^T @ msg (transpose-A dot_general)
    agg = lax.dot_general(gcol, msg, (((0,), (0,)), ((), ())),
                          preferred_element_type=jnp.float32)            # [N, D]

    # (1 + eps) * x + aggregated
    z = eps_ref[l] * h + agg
    # mlp: Linear(D,2D) -> BatchNorm1d(2D) (eval, folded) -> ReLU -> Linear(2D,D)
    z1 = jnp.dot(z, w1_ref[...], preferred_element_type=jnp.float32) + b1_ref[...]
    z1 = jnp.maximum(z1 * s1_ref[...] + t1_ref[...], 0.0)
    z2 = jnp.dot(z1, w2_ref[...], preferred_element_type=jnp.float32) + b2_ref[...]
    # outer BatchNorm1d(D) (eval, folded)
    z2 = z2 * s2_ref[...] + t2_ref[...]

    # dropout == identity (eval); ReLU on all but the last layer; residual
    @pl.when(l + 1 < nl)
    def _():
        h_sc[...] = jnp.maximum(z2, 0.0) + h

    # --- last layer: fused attention masks + reg_mask ------------------------
    @pl.when(l + 1 == nl)
    def _():
        nr = z2 + h                                # final node_rep (no ReLU)
        node_b = bias_ref[0]
        edge_b = bias_ref[1]

        # Fused node/edge attention projections, row-oriented (lane-dense):
        # attT = [Wn | We1 | We2]^T @ nr^T  ->  [3, N]   (A @ B^T dot_general)
        attT = lax.dot_general(wattT_ref[...], nr, (((1,), (1,)), ((), ())),
                               preferred_element_type=jnp.float32)       # [3, N]
        nkey_row = _sigmoid(attT[0:1, :] + node_b)                       # [1, N]
        s1r = attT[1:2, :]                                               # nr@We1
        s2r = attT[2:3, :]                                               # nr@We2

        # edge_rep @ Wedge == grow@(nr@We1) + gcol@(nr@We2)  (one-hot select,
        # reassociated); computed row-oriented via A @ B^T.
        elogit = (lax.dot_general(s1r, grow, (((1,), (1,)), ((), ())),
                                  preferred_element_type=jnp.float32)
                  + lax.dot_general(s2r, gcol, (((1,), (1,)), ((), ())),
                                    preferred_element_type=jnp.float32)
                  + edge_b)                                              # [1, E]
        ekey_row = _sigmoid(elogit)

        nkey_ref[...] = nkey_row                                         # [1, N]
        ekey_ref[...] = ekey_row                                         # [1, E]

        # reg_mask: one [4, X] @ [X, G] matmul per pool matrix.
        # packed rows = [mask, 1-mask, (mask>0), 1]   (mask = post-sigmoid key,
        # matching the reference which thresholds sigmoid output).
        def reg(key_row, idx_col, x):
            bmat_t = (lax.broadcasted_iota(jnp.int32, (x, g), 1)
                      == idx_col).astype(jnp.float32)                    # [X, G]
            rid = lax.broadcasted_iota(jnp.int32, (4, x), 0)
            nz_row = (key_row > 0.0).astype(jnp.float32)
            packed = jnp.where(rid == 0, key_row,
                     jnp.where(rid == 1, 1.0 - key_row,
                     jnp.where(rid == 2, nz_row, 1.0)))                  # [4, X]
            return jnp.dot(packed, bmat_t,
                           preferred_element_type=jnp.float32)           # [4, G]

        rn = reg(nkey_row, nbatch_ref[...], n)
        re_ = reg(ekey_row, ebatch_ref[...], e)

        gstat_ref[0:1, :] = rn[0:1, :] + 1e-8                    # node_key_num
        gstat_ref[1:2, :] = rn[1:2, :] + 1e-8                    # node_env_num
        gstat_ref[2:3, :] = rn[2:3, :] / (rn[3:4, :] + 1e-8)     # non_zero_node_ratio
        gstat_ref[3:4, :] = re_[0:1, :] + 1e-8                   # edge_key_num
        gstat_ref[4:5, :] = re_[1:2, :] + 1e-8                   # edge_env_num
        gstat_ref[5:6, :] = re_[2:3, :] / (re_[3:4, :] + 1e-8)   # non_zero_edge_ratio


def run_fused(eps_scales, att_bias, h0, row2d, col2d, nbatch2d, ebatch2d, wattT,
              eemb, w1s, b1s, s1s, t1s, w2s, b2s, s2s, t2s, num_graphs):
    num_layer, e, d = eemb.shape
    n = h0.shape[0]
    g = num_graphs

    def resident(shape):          # same block every layer -> DMA'd once
        return pl.BlockSpec(shape, lambda l, _s=shape: tuple(0 for _ in _s))

    def per_layer(shape):         # leading (squeezed) L axis indexed by the grid
        return pl.BlockSpec((None,) + shape,
                            lambda l, _s=shape: (l,) + tuple(0 for _ in _s))

    smem_spec = pl.BlockSpec(memory_space=SMEM)

    in_specs = [
        smem_spec,                 # eps_scales [L]     (1 + eps) per layer
        smem_spec,                 # att_bias [2]       node_b, edge_b
        resident((n, d)),          # h0
        resident((e, 1)),          # row indices (i32)
        resident((e, 1)),          # col indices (i32)
        resident((n, 1)),          # batch id per node (i32)
        resident((e, 1)),          # batch id per edge (i32)
        resident((3, d)),          # [Wn | We1 | We2]^T
        per_layer((e, d)),         # bond embeddings
        per_layer((d, 2 * d)),     # w1
        per_layer((1, 2 * d)),     # b1
        per_layer((1, 2 * d)),     # s1 (BN scale)
        per_layer((1, 2 * d)),     # t1 (BN shift)
        per_layer((2 * d, d)),     # w2
        per_layer((1, d)),         # b2
        per_layer((1, d)),         # s2
        per_layer((1, d)),         # t2
    ]
    out_shapes = (
        jax.ShapeDtypeStruct((1, n), jnp.float32),    # node_key (lane-dense)
        jax.ShapeDtypeStruct((1, e), jnp.float32),    # edge_key (lane-dense)
        jax.ShapeDtypeStruct((6, g), jnp.float32),    # packed per-graph stats
    )
    out_specs = (
        pl.BlockSpec((1, n), lambda l: (0, 0)),
        pl.BlockSpec((1, e), lambda l: (0, 0)),
        pl.BlockSpec((6, g), lambda l: (0, 0)),
    )
    return pl.pallas_call(
        fused_gin_mask_kernel,
        out_shape=out_shapes,
        grid=(num_layer,),
        in_specs=in_specs,
        out_specs=out_specs,
        scratch_shapes=[pltpu.VMEM((e, n), jnp.float32),   # grow (one-hot, f32)
                        pltpu.VMEM((e, n), jnp.float32),   # gcol (one-hot, f32)
                        pltpu.VMEM((n, d), jnp.float32)],  # carried h
        compiler_params=pltpu.CompilerParams(
            dimension_semantics=("arbitrary",)),           # carried state axis
    )(eps_scales, att_bias, h0, row2d, col2d, nbatch2d, ebatch2d, wattT,
      eemb, w1s, b1s, s1s, t1s, w2s, b2s, s2s, t2s)


# ---------------------------------------------------------------------------
# Parameter init (deterministic, synthetic) + full forward wrapper
# ---------------------------------------------------------------------------
ATOM_VOCAB = (13, 7)   # two atom feature columns
BOND_VOCAB = (5, 4)    # two bond feature columns


def fold_bn(gamma, beta, mean, var, eps=1e-5):
    scale = gamma / jnp.sqrt(var + eps)
    shift = beta - mean * scale
    return scale[None, :], shift[None, :]


def init_params(key, num_layer, emb_dim):
    ks = iter(jax.random.split(key, 64))
    p = {}
    p["atom_emb"] = [jax.random.normal(next(ks), (v, emb_dim), jnp.float32) * 0.1
                     for v in ATOM_VOCAB]
    p["layers"] = []
    for _ in range(num_layer):
        lp = {}
        lp["bond_emb"] = [jax.random.normal(next(ks), (v, emb_dim), jnp.float32) * 0.1
                          for v in BOND_VOCAB]
        w1 = jax.random.normal(next(ks), (emb_dim, 2 * emb_dim), jnp.float32) * 0.1
        b1 = jax.random.normal(next(ks), (2 * emb_dim,), jnp.float32) * 0.01
        g1 = 1.0 + 0.05 * jax.random.normal(next(ks), (2 * emb_dim,), jnp.float32)
        bt1 = 0.01 * jax.random.normal(next(ks), (2 * emb_dim,), jnp.float32)
        s1, t1 = fold_bn(g1, bt1, jnp.zeros((2 * emb_dim,)), jnp.ones((2 * emb_dim,)))
        w2 = jax.random.normal(next(ks), (2 * emb_dim, emb_dim), jnp.float32) * 0.1
        b2 = jax.random.normal(next(ks), (emb_dim,), jnp.float32) * 0.01
        g2 = 1.0 + 0.05 * jax.random.normal(next(ks), (emb_dim,), jnp.float32)
        bt2 = 0.01 * jax.random.normal(next(ks), (emb_dim,), jnp.float32)
        s2, t2 = fold_bn(g2, bt2, jnp.zeros((emb_dim,)), jnp.ones((emb_dim,)))
        lp["mm"] = (w1, b1[None, :], s1, t1, w2, b2[None, :], s2, t2)
        p["layers"].append(lp)
    p["node_att_w"] = jax.random.normal(next(ks), (emb_dim, 1), jnp.float32) * 0.1
    p["node_att_b"] = jax.random.normal(next(ks), (1, 1), jnp.float32) * 0.01
    we = jax.random.normal(next(ks), (2 * emb_dim, 1), jnp.float32) * 0.1
    p["edge_att_w1"] = we[:emb_dim]
    p["edge_att_w2"] = we[emb_dim:]
    p["edge_att_b"] = jax.random.normal(next(ks), (1, 1), jnp.float32) * 0.01
    return p


@functools.partial(jax.jit, static_argnames=("num_layer", "num_graphs"))
def graph_mol_masker_forward(params, x, edge_index, edge_attr, batch,
                             num_layer, num_graphs):
    n = x.shape[0]
    e = edge_index.shape[1]
    g = num_graphs                      # static: no batch[-1].item() host sync
    row, col = edge_index[0], edge_index[1]

    # AtomEncoder / BondEncoder: sum of per-feature embedding lookups (glue)
    h0 = sum(tbl[x[:, i]] for i, tbl in enumerate(params["atom_emb"]))
    eemb = jnp.stack(
        [sum(tbl[edge_attr[:, i]] for i, tbl in enumerate(lp["bond_emb"]))
         for lp in params["layers"]], axis=0)                          # [L, E, D]

    def stack(idx):
        return jnp.stack([lp["mm"][idx] for lp in params["layers"]], axis=0)

    w1s, b1s, s1s, t1s, w2s, b2s, s2s, t2s = (stack(i) for i in range(8))

    # (1 + eps) per layer; eps parameter initialized to 0 in the reference.
    eps_scales = jnp.ones((num_layer,), jnp.float32)
    att_bias = jnp.concatenate([params["node_att_b"].reshape(-1),
                                params["edge_att_b"].reshape(-1)]).astype(jnp.float32)
    # fused attention projection weights, pre-transposed: [3, D]
    wattT = jnp.concatenate([params["node_att_w"], params["edge_att_w1"],
                             params["edge_att_w2"]], axis=1).T.astype(jnp.float32)

    # tiny i32 index columns (one-hot matrices are built in-kernel from these)
    row2d = row.astype(jnp.int32).reshape(e, 1)
    col2d = col.astype(jnp.int32).reshape(e, 1)
    nbatch2d = batch.astype(jnp.int32).reshape(n, 1)
    ebatch2d = batch[row].astype(jnp.int32).reshape(e, 1)

    nkey_row, ekey_row, gstat = run_fused(
        eps_scales, att_bias, h0, row2d, col2d, nbatch2d, ebatch2d, wattT,
        eemb, w1s, b1s, s1s, t1s, w2s, b2s, s2s, t2s, g)

    # lane-dense kernel outputs reshaped to reference layout (free in XLA)
    return {
        "node_key": nkey_row.reshape(n, 1),
        "edge_key": ekey_row.reshape(e, 1),
        "node_key_num": gstat[0].reshape(g, 1),
        "node_env_num": gstat[1].reshape(g, 1),
        "edge_key_num": gstat[3].reshape(g, 1),
        "edge_env_num": gstat[4].reshape(g, 1),
        "non_zero_node_ratio": gstat[2].reshape(g, 1),
        "non_zero_edge_ratio": gstat[5].reshape(g, 1),
    }


if __name__ == "__main__":
    num_layer = 2
    emb_dim = 32
    N, E, G = 16, 32, 2

    key = jax.random.PRNGKey(0)
    k_param, k_x, k_ea, k_e0, k_e1 = jax.random.split(key, 5)

    params = init_params(k_param, num_layer, emb_dim)

    # integer atom / bond features
    x = jnp.stack([jax.random.randint(jax.random.fold_in(k_x, i), (N,), 0, v)
                   for i, v in enumerate(ATOM_VOCAB)], axis=1).astype(jnp.int32)
    edge_attr = jnp.stack([jax.random.randint(jax.random.fold_in(k_ea, i), (E,), 0, v)
                           for i, v in enumerate(BOND_VOCAB)], axis=1).astype(jnp.int32)

    # batch: first 8 nodes -> graph 0, last 8 -> graph 1; edges stay in-graph
    batch = jnp.concatenate([jnp.zeros((N // 2,), jnp.int32),
                             jnp.ones((N // 2,), jnp.int32)])
    src0 = jax.random.randint(k_e0, (2, E // 2), 0, N // 2)
    src1 = jax.random.randint(k_e1, (2, E // 2), N // 2, N)
    edge_index = jnp.concatenate([src0, src1], axis=1).astype(jnp.int32)  # [2, E]

    out = graph_mol_masker_forward(params, x, edge_index, edge_attr, batch,
                                   num_layer=num_layer, num_graphs=G)
    jax.block_until_ready(out)

    assert out["node_key"].shape == (N, 1)
    assert out["edge_key"].shape == (E, 1)
    assert out["node_key_num"].shape == (G, 1)
    assert out["node_env_num"].shape == (G, 1)
    assert out["edge_key_num"].shape == (G, 1)
    assert out["edge_env_num"].shape == (G, 1)
    assert out["non_zero_node_ratio"].shape == (G, 1)
    assert out["non_zero_edge_ratio"].shape == (G, 1)
    assert bool(jnp.all(jnp.isfinite(out["node_key"])))
    assert bool(jnp.all(jnp.isfinite(out["edge_key"])))
    assert bool(jnp.all(jnp.isfinite(out["node_key_num"])))
    assert bool(jnp.all(jnp.isfinite(out["non_zero_edge_ratio"])))
    print("KERNEL_OK")
</pallas_src>

<mosaic_0001>
module attributes {stable_mosaic.version = 11 : i64} {
  func.func @fused_gin_mask_kernel(%arg0: i32, %arg1: memref<2xf32, #tpu.memory_space<smem>>, %arg2: memref<2xf32, #tpu.memory_space<smem>>, %arg3: memref<16x32xf32, #tpu.memory_space<vmem>>, %arg4: memref<32x1xi32, #tpu.memory_space<vmem>>, %arg5: memref<32x1xi32, #tpu.memory_space<vmem>>, %arg6: memref<16x1xi32, #tpu.memory_space<vmem>>, %arg7: memref<32x1xi32, #tpu.memory_space<vmem>>, %arg8: memref<3x32xf32, #tpu.memory_space<vmem>>, %arg9: memref<1x32x32xf32, #tpu.memory_space<vmem>>, %arg10: memref<1x32x64xf32, #tpu.memory_space<vmem>>, %arg11: memref<1x1x64xf32, #tpu.memory_space<vmem>>, %arg12: memref<1x1x64xf32, #tpu.memory_space<vmem>>, %arg13: memref<1x1x64xf32, #tpu.memory_space<vmem>>, %arg14: memref<1x64x32xf32, #tpu.memory_space<vmem>>, %arg15: memref<1x1x32xf32, #tpu.memory_space<vmem>>, %arg16: memref<1x1x32xf32, #tpu.memory_space<vmem>>, %arg17: memref<1x1x32xf32, #tpu.memory_space<vmem>>, %arg18: memref<1x16xf32, #tpu.memory_space<vmem>>, %arg19: memref<1x32xf32, #tpu.memory_space<vmem>>, %arg20: memref<6x2xf32, #tpu.memory_space<vmem>>, %arg21: memref<32x16xf32, #tpu.memory_space<vmem>>, %arg22: memref<32x16xf32, #tpu.memory_space<vmem>>, %arg23: memref<16x32xf32, #tpu.memory_space<vmem>>) attributes {dimension_semantics = [#tpu.dimension_semantics<arbitrary>], iteration_bounds = array<i64: 2>, scalar_prefetch = 0 : i64, scratch_operands = 3 : i64, tpu.core_type = #tpu.core_type<tc>, window_params = [{transform_indices = @transform_0, window_bounds = array<i64: 2>}, {transform_indices = @transform_1, window_bounds = array<i64: 2>}, {pipeline_mode = #tpu.pipeline_mode<synchronous>, transform_indices = @transform_2, window_bounds = array<i64: 16, 32>}, {pipeline_mode = #tpu.pipeline_mode<synchronous>, transform_indices = @transform_3, window_bounds = array<i64: 32, 1>}, {pipeline_mode = #tpu.pipeline_mode<synchronous>, transform_indices = @transform_4, window_bounds = array<i64: 32, 1>}, {pipeline_mode = #tpu.pipeline_mode<synchronous>, transform_indices = @transform_5, window_bounds = array<i64: 16, 1>}, {pipeline_mode = #tpu.pipeline_mode<synchronous>, transform_indices = @transform_6, window_bounds = array<i64: 32, 1>}, {pipeline_mode = #tpu.pipeline_mode<synchronous>, transform_indices = @transform_7, window_bounds = array<i64: 3, 32>}, {transform_indices = @transform_8, window_bounds = array<i64: 1, 32, 32>}, {transform_indices = @transform_9, window_bounds = array<i64: 1, 32, 64>}, {transform_indices = @transform_10, window_bounds = array<i64: 1, 1, 64>}, {transform_indices = @transform_11, window_bounds = array<i64: 1, 1, 64>}, {transform_indices = @transform_12, window_bounds = array<i64: 1, 1, 64>}, {transform_indices = @transform_13, window_bounds = array<i64: 1, 64, 32>}, {transform_indices = @transform_14, window_bounds = array<i64: 1, 1, 32>}, {transform_indices = @transform_15, window_bounds = array<i64: 1, 1, 32>}, {transform_indices = @transform_16, window_bounds = array<i64: 1, 1, 32>}, {pipeline_mode = #tpu.pipeline_mode<synchronous>, transform_indices = @transform_17, window_bounds = array<i64: 1, 16>}, {pipeline_mode = #tpu.pipeline_mode<synchronous>, transform_indices = @transform_18, window_bounds = array<i64: 1, 32>}, {pipeline_mode = #tpu.pipeline_mode<synchronous>, transform_indices = @transform_19, window_bounds = array<i64: 6, 2>}]} {
    %c0_i32 = arith.constant 0 : i32
    %0 = arith.cmpi eq, %arg0, %c0_i32 : i32
    %1 = arith.extui %0 : i1 to i32
    %c0_i32_0 = arith.constant 0 : i32
    %2 = arith.cmpi ne, %1, %c0_i32_0 : i32
    scf.if %2 {
      %58 = tpu.iota {dimensions = array<i32: 1>} : vector<32x16xi32>
      %c0_42 = arith.constant 0 : index
      %c0_43 = arith.constant 0 : index
      %59 = vector.load %arg4[%c0_42, %c0_43] : memref<32x1xi32, #tpu.memory_space<vmem>>, vector<32x1xi32>
      %60 = vector.broadcast %59 : vector<32x1xi32> to vector<32x16xi32>
      %61 = arith.cmpi eq, %58, %60 : vector<32x16xi32>
      %62 = arith.extui %61 : vector<32x16xi1> to vector<32x16xi32>
      %63 = arith.sitofp %62 : vector<32x16xi32> to vector<32x16xf32>
      %c0_44 = arith.constant 0 : index
      %c0_45 = arith.constant 0 : index
      %64 = vector.load %arg21[%c0_44, %c0_45] : memref<32x16xf32, #tpu.memory_space<vmem>>, vector<32x16xf32>
      tpu.vector_store %arg21[%c0_44, %c0_45], %63 {strides = array<i32>} : memref<32x16xf32, #tpu.memory_space<vmem>>, vector<32x16xf32>,
      %c0_46 = arith.constant 0 : index
      %c0_47 = arith.constant 0 : index
      %65 = vector.load %arg5[%c0_46, %c0_47] : memref<32x1xi32, #tpu.memory_space<vmem>>, vector<32x1xi32>
      %66 = vector.broadcast %65 : vector<32x1xi32> to vector<32x16xi32>
      %67 = arith.cmpi eq, %58, %66 : vector<32x16xi32>
      %68 = arith.extui %67 : vector<32x16xi1> to vector<32x16xi32>
      %69 = arith.sitofp %68 : vector<32x16xi32> to vector<32x16xf32>
      %c0_48 = arith.constant 0 : index
      %c0_49 = arith.constant 0 : index
      %70 = vector.load %arg22[%c0_48, %c0_49] : memref<32x16xf32, #tpu.memory_space<vmem>>, vector<32x16xf32>
      tpu.vector_store %arg22[%c0_48, %c0_49], %69 {strides = array<i32>} : memref<32x16xf32, #tpu.memory_space<vmem>>, vector<32x16xf32>,
      %c0_50 = arith.constant 0 : index
      %c0_51 = arith.constant 0 : index
      %71 = vector.load %arg3[%c0_50, %c0_51] : memref<16x32xf32, #tpu.memory_space<vmem>>, vector<16x32xf32>
      %c0_52 = arith.constant 0 : index
      %c0_53 = arith.constant 0 : index
      %72 = vector.load %arg23[%c0_52, %c0_53] : memref<16x32xf32, #tpu.memory_space<vmem>>, vector<16x32xf32>
      tpu.vector_store %arg23[%c0_52, %c0_53], %71 {strides = array<i32>} : memref<16x32xf32, #tpu.memory_space<vmem>>, vector<16x32xf32>,
    } else {
    }
    %c0 = arith.constant 0 : index
    %c0_1 = arith.constant 0 : index
    %3 = vector.load %arg23[%c0, %c0_1] : memref<16x32xf32, #tpu.memory_space<vmem>>, vector<16x32xf32>
    %c0_2 = arith.constant 0 : index
    %c0_3 = arith.constant 0 : index
    %4 = vector.load %arg21[%c0_2, %c0_3] : memref<32x16xf32, #tpu.memory_space<vmem>>, vector<32x16xf32>
    %c0_4 = arith.constant 0 : index
    %c0_5 = arith.constant 0 : index
    %5 = vector.load %arg22[%c0_4, %c0_5] : memref<32x16xf32, #tpu.memory_space<vmem>>, vector<32x16xf32>
    %cst = arith.constant dense<0.000000e+00> : vector<32x32xf32>
    %6 = tpu.matmul %4, %3, %cst {dimension_numbers = #tpu.dot_dimension_numbers<[1], [0], [0], [1], [0, 0, 1, 1], [], []>} : vector<32x16xf32>, vector<16x32xf32>, vector<32x32xf32> -> vector<32x32xf32>
    %c0_6 = arith.constant 0 : index
    %c0_7 = arith.constant 0 : index
    %c0_8 = arith.constant 0 : index
    %7 = vector.load %arg9[%c0_6, %c0_7, %c0_8] : memref<1x32x32xf32, #tpu.memory_space<vmem>>, vector<1x32x32xf32>
    %8 = vector.shape_cast %7 : vector<1x32x32xf32> to vector<32x32xf32>
    %9 = arith.addf %6, %8 : vector<32x32xf32>
    %cst_9 = arith.constant 0.000000e+00 : f32
    %10 = vector.broadcast %cst_9 : f32 to vector<32x32xf32>
    %11 = arith.maximumf %9, %10 : vector<32x32xf32>
    %cst_10 = arith.constant dense<0.000000e+00> : vector<16x32xf32>
    %12 = tpu.matmul %5, %11, %cst_10 {dimension_numbers = #tpu.dot_dimension_numbers<[0], [0], [1], [1], [0, 1, 1, 1], [], []>} : vector<32x16xf32>, vector<32x32xf32>, vector<16x32xf32> -> vector<16x32xf32>
    %13 = arith.index_cast %arg0 : i32 to index
    %14 = memref.load %arg1[%13] : memref<2xf32, #tpu.memory_space<smem>>
    %15 = vector.broadcast %14 : f32 to vector<16x32xf32>
    %16 = arith.mulf %15, %3 : vector<16x32xf32>
    %17 = arith.addf %16, %12 : vector<16x32xf32>
    %c0_11 = arith.constant 0 : index
    %c0_12 = arith.constant 0 : index
    %c0_13 = arith.constant 0 : index
    %18 = vector.load %arg10[%c0_11, %c0_12, %c0_13] : memref<1x32x64xf32, #tpu.memory_space<vmem>>, vector<1x32x64xf32>
    %19 = vector.shape_cast %18 : vector<1x32x64xf32> to vector<32x64xf32>
    %cst_14 = arith.constant dense<0.000000e+00> : vector<16x64xf32>
    %20 = tpu.matmul %17, %19, %cst_14 {dimension_numbers = #tpu.dot_dimension_numbers<[1], [0], [0], [1], [0, 0, 1, 1], [], []>} : vector<16x32xf32>, vector<32x64xf32>, vector<16x64xf32> -> vector<16x64xf32>
    %c0_15 = arith.constant 0 : index
    %c0_16 = arith.constant 0 : index
    %c0_17 = arith.constant 0 : index
    %21 = vector.load %arg11[%c0_15, %c0_16, %c0_17] : memref<1x1x64xf32, #tpu.memory_space<vmem>>, vector<1x1x64xf32>
    %22 = vector.shape_cast %21 : vector<1x1x64xf32> to vector<1x64xf32>
    %23 = vector.broadcast %22 : vector<1x64xf32> to vector<16x64xf32>
    %24 = arith.addf %20, %23 : vector<16x64xf32>
    %c0_18 = arith.constant 0 : index
    %c0_19 = arith.constant 0 : index
    %c0_20 = arith.constant 0 : index
    %25 = vector.load %arg12[%c0_18, %c0_19, %c0_20] : memref<1x1x64xf32, #tpu.memory_space<vmem>>, vector<1x1x64xf32>
    %26 = vector.shape_cast %25 : vector<1x1x64xf32> to vector<1x64xf32>
    %27 = vector.broadcast %26 : vector<1x64xf32> to vector<16x64xf32>
    %28 = arith.mulf %24, %27 : vector<16x64xf32>
    %c0_21 = arith.constant 0 : index
    %c0_22 = arith.constant 0 : index
    %c0_23 = arith.constant 0 : index
    %29 = vector.load %arg13[%c0_21, %c0_22, %c0_23] : memref<1x1x64xf32, #tpu.memory_space<vmem>>, vector<1x1x64xf32>
    %30 = vector.shape_cast %29 : vector<1x1x64xf32> to vector<1x64xf32>
    %31 = vector.broadcast %30 : vector<1x64xf32> to vector<16x64xf32>
    %32 = arith.addf %28, %31 : vector<16x64xf32>
    %cst_24 = arith.constant 0.000000e+00 : f32
    %33 = vector.broadcast %cst_24 : f32 to vector<16x64xf32>
    %34 = arith.maximumf %32, %33 : vector<16x64xf32>
    %c0_25 = arith.constant 0 : index
    %c0_26 = arith.constant 0 : index
    %c0_27 = arith.constant 0 : index
    %35 = vector.load %arg14[%c0_25, %c0_26, %c0_27] : memref<1x64x32xf32, #tpu.memory_space<vmem>>, vector<1x64x32xf32>
    %36 = vector.shape_cast %35 : vector<1x64x32xf32> to vector<64x32xf32>
    %cst_28 = arith.constant dense<0.000000e+00> : vector<16x32xf32>
    %37 = tpu.matmul %34, %36, %cst_28 {dimension_numbers = #tpu.dot_dimension_numbers<[1], [0], [0], [1], [0, 0, 1, 1], [], []>} : vector<16x64xf32>, vector<64x32xf32>, vector<16x32xf32> -> vector<16x32xf32>
    %c0_29 = arith.constant 0 : index
    %c0_30 = arith.constant 0 : index
    %c0_31 = arith.constant 0 : index
    %38 = vector.load %arg15[%c0_29, %c0_30, %c0_31] : memref<1x1x32xf32, #tpu.memory_space<vmem>>, vector<1x1x32xf32>
    %39 = vector.shape_cast %38 : vector<1x1x32xf32> to vector<1x32xf32>
    %40 = vector.broadcast %39 : vector<1x32xf32> to vector<16x32xf32>
    %41 = arith.addf %37, %40 : vector<16x32xf32>
    %c0_32 = arith.constant 0 : index
    %c0_33 = arith.constant 0 : index
    %c0_34 = arith.constant 0 : index
    %42 = vector.load %arg16[%c0_32, %c0_33, %c0_34] : memref<1x1x32xf32, #tpu.memory_space<vmem>>, vector<1x1x32xf32>
    %43 = vector.shape_cast %42 : vector<1x1x32xf32> to vector<1x32xf32>
    %44 = vector.broadcast %43 : vector<1x32xf32> to vector<16x32xf32>
    %45 = arith.mulf %41, %44 : vector<16x32xf32>
    %c0_35 = arith.constant 0 : index
    %c0_36 = arith.constant 0 : index
    %c0_37 = arith.constant 0 : index
    %46 = vector.load %arg17[%c0_35, %c0_36, %c0_37] : memref<1x1x32xf32, #tpu.memory_space<vmem>>, vector<1x1x32xf32>
    %47 = vector.shape_cast %46 : vector<1x1x32xf32> to vector<1x32xf32>
    %48 = vector.broadcast %47 : vector<1x32xf32> to vector<16x32xf32>
    %49 = arith.addf %45, %48 : vector<16x32xf32>
    %c1_i32 = arith.constant 1 : i32
    %50 = arith.addi %arg0, %c1_i32 : i32
    %c2_i32 = arith.constant 2 : i32
    %51 = arith.cmpi slt, %50, %c2_i32 : i32
    %52 = arith.extui %51 : i1 to i32
    %c0_i32_38 = arith.constant 0 : i32
    %53 = arith.cmpi ne, %52, %c0_i32_38 : i32
    scf.if %53 {
      %cst_42 = arith.constant 0.000000e+00 : f32
      %58 = vector.broadcast %cst_42 : f32 to vector<16x32xf32>
      %59 = arith.maximumf %49, %58 : vector<16x32xf32>
      %60 = arith.addf %59, %3 : vector<16x32xf32>
      %c0_43 = arith.constant 0 : index
      %c0_44 = arith.constant 0 : index
      %61 = vector.load %arg23[%c0_43, %c0_44] : memref<16x32xf32, #tpu.memory_space<vmem>>, vector<16x32xf32>
      tpu.vector_store %arg23[%c0_43, %c0_44], %60 {strides = array<i32>} : memref<16x32xf32, #tpu.memory_space<vmem>>, vector<16x32xf32>,
    } else {
    }
    %c1_i32_39 = arith.constant 1 : i32
    %54 = arith.addi %arg0, %c1_i32_39 : i32
    %c2_i32_40 = arith.constant 2 : i32
    %55 = arith.cmpi eq, %54, %c2_i32_40 : i32
    %56 = arith.extui %55 : i1 to i32
    %c0_i32_41 = arith.constant 0 : i32
    %57 = arith.cmpi ne, %56, %c0_i32_41 : i32
    scf.if %57 {
      %58 = arith.addf %49, %3 : vector<16x32xf32>
      %c0_42 = arith.constant 0 : index
      %59 = memref.load %arg2[%c0_42] : memref<2xf32, #tpu.memory_space<smem>>
      %c1 = arith.constant 1 : index
      %60 = memref.load %arg2[%c1] : memref<2xf32, #tpu.memory_space<smem>>
      %c0_43 = arith.constant 0 : index
      %c0_44 = arith.constant 0 : index
      %61 = vector.load %arg8[%c0_43, %c0_44] : memref<3x32xf32, #tpu.memory_space<vmem>>, vector<3x32xf32>
      %cst_45 = arith.constant dense<0.000000e+00> : vector<3x16xf32>
      %62 = tpu.matmul %61, %58, %cst_45 {dimension_numbers = #tpu.dot_dimension_numbers<[1], [1], [0], [0], [0, 0, 1, 0], [], []>} : vector<3x32xf32>, vector<16x32xf32>, vector<3x16xf32> -> vector<3x16xf32>
      %63 = vector.extract_strided_slice %62 {offsets = [0, 0], sizes = [1, 16], strides = [1, 1]} : vector<3x16xf32> to vector<1x16xf32>
      %64 = vector.broadcast %59 : f32 to vector<1x16xf32>
      %65 = arith.addf %63, %64 : vector<1x16xf32>
      %cst_46 = arith.constant 0.000000e+00 : f32
      %66 = vector.broadcast %cst_46 : f32 to vector<1x16xf32>
      %67 = arith.subf %66, %65 : vector<1x16xf32>
      %68 = math.exp %67 : vector<1x16xf32>
      %cst_47 = arith.constant 1.000000e+00 : f32
      %69 = vector.broadcast %cst_47 : f32 to vector<1x16xf32>
      %70 = arith.addf %69, %68 : vector<1x16xf32>
      %cst_48 = arith.constant 1.000000e+00 : f32
      %71 = vector.broadcast %cst_48 : f32 to vector<1x16xf32>
      %72 = arith.divf %71, %70 : vector<1x16xf32>
      %73 = vector.extract_strided_slice %62 {offsets = [1, 0], sizes = [1, 16], strides = [1, 1]} : vector<3x16xf32> to vector<1x16xf32>
      %74 = vector.extract_strided_slice %62 {offsets = [2, 0], sizes = [1, 16], strides = [1, 1]} : vector<3x16xf32> to vector<1x16xf32>
      %cst_49 = arith.constant dense<0.000000e+00> : vector<1x32xf32>
      %75 = tpu.matmul %73, %4, %cst_49 {dimension_numbers = #tpu.dot_dimension_numbers<[1], [1], [0], [0], [0, 0, 1, 0], [], []>} : vector<1x16xf32>, vector<32x16xf32>, vector<1x32xf32> -> vector<1x32xf32>
      %cst_50 = arith.constant dense<0.000000e+00> : vector<1x32xf32>
      %76 = tpu.matmul %74, %5, %cst_50 {dimension_numbers = #tpu.dot_dimension_numbers<[1], [1], [0], [0], [0, 0, 1, 0], [], []>} : vector<1x16xf32>, vector<32x16xf32>, vector<1x32xf32> -> vector<1x32xf32>
      %77 = arith.addf %75, %76 : vector<1x32xf32>
      %78 = vector.broadcast %60 : f32 to vector<1x32xf32>
      %79 = arith.addf %77, %78 : vector<1x32xf32>
      %cst_51 = arith.constant 0.000000e+00 : f32
      %80 = vector.broadcast %cst_51 : f32 to vector<1x32xf32>
      %81 = arith.subf %80, %79 : vector<1x32xf32>
      %82 = math.exp %81 : vector<1x32xf32>
      %cst_52 = arith.constant 1.000000e+00 : f32
      %83 = vector.broadcast %cst_52 : f32 to vector<1x32xf32>
      %84 = arith.addf %83, %82 : vector<1x32xf32>
      %cst_53 = arith.constant 1.000000e+00 : f32
      %85 = vector.broadcast %cst_53 : f32 to vector<1x32xf32>
      %86 = arith.divf %85, %84 : vector<1x32xf32>
      %c0_54 = arith.constant 0 : index
      %c0_55 = arith.constant 0 : index
      %87 = vector.load %arg18[%c0_54, %c0_55] : memref<1x16xf32, #tpu.memory_space<vmem>>, vector<1x16xf32>
      tpu.vector_store %arg18[%c0_54, %c0_55], %72 {strides = array<i32>} : memref<1x16xf32, #tpu.memory_space<vmem>>, vector<1x16xf32>,
      %c0_56 = arith.constant 0 : index
      %c0_57 = arith.constant 0 : index
      %88 = vector.load %arg19[%c0_56, %c0_57] : memref<1x32xf32, #tpu.memory_space<vmem>>, vector<1x32xf32>
      tpu.vector_store %arg19[%c0_56, %c0_57], %86 {strides = array<i32>} : memref<1x32xf32, #tpu.memory_space<vmem>>, vector<1x32xf32>,
      %c0_58 = arith.constant 0 : index
      %c0_59 = arith.constant 0 : index
      %89 = vector.load %arg6[%c0_58, %c0_59] : memref<16x1xi32, #tpu.memory_space<vmem>>, vector<16x1xi32>
      %90 = tpu.iota {dimensions = array<i32: 1>} : vector<16x2xi32>
      %91 = vector.broadcast %89 : vector<16x1xi32> to vector<16x2xi32>
      %92 = arith.cmpi eq, %90, %91 : vector<16x2xi32>
      %93 = arith.extui %92 : vector<16x2xi1> to vector<16x2xi32>
      %94 = arith.sitofp %93 : vector<16x2xi32> to vector<16x2xf32>
      %95 = tpu.iota {dimensions = array<i32: 0>} : vector<4x16xi32>
      %cst_60 = arith.constant 0.000000e+00 : f32
      %96 = vector.broadcast %cst_60 : f32 to vector<1x16xf32>
      %97 = arith.cmpf ogt, %72, %96 : vector<1x16xf32>
      %98 = arith.extui %97 : vector<1x16xi1> to vector<1x16xi32>
      %99 = arith.sitofp %98 : vector<1x16xi32> to vector<1x16xf32>
      %c0_i32_61 = arith.constant 0 : i32
      %100 = vector.broadcast %c0_i32_61 : i32 to vector<4x16xi32>
      %101 = arith.cmpi eq, %95, %100 : vector<4x16xi32>
      %c1_i32_62 = arith.constant 1 : i32
      %102 = vector.broadcast %c1_i32_62 : i32 to vector<4x16xi32>
      %103 = arith.cmpi eq, %95, %102 : vector<4x16xi32>
      %cst_63 = arith.constant 1.000000e+00 : f32
      %104 = vector.broadcast %cst_63 : f32 to vector<1x16xf32>
      %105 = arith.subf %104, %72 : vector<1x16xf32>
      %c2_i32_64 = arith.constant 2 : i32
      %106 = vector.broadcast %c2_i32_64 : i32 to vector<4x16xi32>
      %107 = arith.cmpi eq, %95, %106 : vector<4x16xi32>
      %cst_65 = arith.constant 1.000000e+00 : f32
      %108 = vector.shape_cast %99 : vector<1x16xf32> to vector<1x16xf32>
      %109 = vector.broadcast %108 : vector<1x16xf32> to vector<4x16xf32>
      %110 = vector.broadcast %cst_65 : f32 to vector<4x16xf32>
      %111 = arith.select %107, %109, %110 : vector<4x16xi1>, vector<4x16xf32>
      %112 = vector.shape_cast %105 : vector<1x16xf32> to vector<1x16xf32>
      %113 = vector.broadcast %112 : vector<1x16xf32> to vector<4x16xf32>
      %114 = arith.select %103, %113, %111 : vector<4x16xi1>, vector<4x16xf32>
      %115 = vector.shape_cast %72 : vector<1x16xf32> to vector<1x16xf32>
      %116 = vector.broadcast %115 : vector<1x16xf32> to vector<4x16xf32>
      %117 = arith.select %101, %116, %114 : vector<4x16xi1>, vector<4x16xf32>
      %cst_66 = arith.constant dense<0.000000e+00> : vector<4x2xf32>
      %118 = tpu.matmul %117, %94, %cst_66 {dimension_numbers = #tpu.dot_dimension_numbers<[1], [0], [0], [1], [0, 0, 1, 1], [], []>} : vector<4x16xf32>, vector<16x2xf32>, vector<4x2xf32> -> vector<4x2xf32>
      %c0_67 = arith.constant 0 : index
      %c0_68 = arith.constant 0 : index
      %119 = vector.load %arg7[%c0_67, %c0_68] : memref<32x1xi32, #tpu.memory_space<vmem>>, vector<32x1xi32>
      %120 = tpu.iota {dimensions = array<i32: 1>} : vector<32x2xi32>
      %121 = vector.broadcast %119 : vector<32x1xi32> to vector<32x2xi32>
      %122 = arith.cmpi eq, %120, %121 : vector<32x2xi32>
      %123 = arith.extui %122 : vector<32x2xi1> to vector<32x2xi32>
      %124 = arith.sitofp %123 : vector<32x2xi32> to vector<32x2xf32>
      %125 = tpu.iota {dimensions = array<i32: 0>} : vector<4x32xi32>
      %cst_69 = arith.constant 0.000000e+00 : f32
      %126 = vector.broadcast %cst_69 : f32 to vector<1x32xf32>
      %127 = arith.cmpf ogt, %86, %126 : vector<1x32xf32>
      %128 = arith.extui %127 : vector<1x32xi1> to vector<1x32xi32>
      %129 = arith.sitofp %128 : vector<1x32xi32> to vector<1x32xf32>
      %c0_i32_70 = arith.constant 0 : i32
      %130 = vector.broadcast %c0_i32_70 : i32 to vector<4x32xi32>
      %131 = arith.cmpi eq, %125, %130 : vector<4x32xi32>
      %c1_i32_71 = arith.constant 1 : i32
      %132 = vector.broadcast %c1_i32_71 : i32 to vector<4x32xi32>
      %133 = arith.cmpi eq, %125, %132 : vector<4x32xi32>
      %cst_72 = arith.constant 1.000000e+00 : f32
      %134 = vector.broadcast %cst_72 : f32 to vector<1x32xf32>
      %135 = arith.subf %134, %86 : vector<1x32xf32>
      %c2_i32_73 = arith.constant 2 : i32
      %136 = vector.broadcast %c2_i32_73 : i32 to vector<4x32xi32>
      %137 = arith.cmpi eq, %125, %136 : vector<4x32xi32>
      %cst_74 = arith.constant 1.000000e+00 : f32
      %138 = vector.shape_cast %129 : vector<1x32xf32> to vector<1x32xf32>
      %139 = vector.broadcast %138 : vector<1x32xf32> to vector<4x32xf32>
      %140 = vector.broadcast %cst_74 : f32 to vector<4x32xf32>
      %141 = arith.select %137, %139, %140 : vector<4x32xi1>, vector<4x32xf32>
      %142 = vector.shape_cast %135 : vector<1x32xf32> to vector<1x32xf32>
      %143 = vector.broadcast %142 : vector<1x32xf32> to vector<4x32xf32>
      %144 = arith.select %133, %143, %141 : vector<4x32xi1>, vector<4x32xf32>
      %145 = vector.shape_cast %86 : vector<1x32xf32> to vector<1x32xf32>
      %146 = vector.broadcast %145 : vector<1x32xf32> to vector<4x32xf32>
      %147 = arith.select %131, %146, %144 : vector<4x32xi1>, vector<4x32xf32>
      %cst_75 = arith.constant dense<0.000000e+00> : vector<4x2xf32>
      %148 = tpu.matmul %147, %124, %cst_75 {dimension_numbers = #tpu.dot_dimension_numbers<[1], [0], [0], [1], [0, 0, 1, 1], [], []>} : vector<4x32xf32>, vector<32x2xf32>, vector<4x2xf32> -> vector<4x2xf32>
      %149 = vector.extract_strided_slice %118 {offsets = [0, 0], sizes = [1, 2], strides = [1, 1]} : vector<4x2xf32> to vector<1x2xf32>
      %cst_76 = arith.constant 9.99999993E-9 : f32
      %150 = vector.broadcast %cst_76 : f32 to vector<1x2xf32>
      %151 = arith.addf %149, %150 : vector<1x2xf32>
      %c0_77 = arith.constant 0 : index
      %c0_78 = arith.constant 0 : index
      %152 = vector.load %arg20[%c0_77, %c0_78] : memref<6x2xf32, #tpu.memory_space<vmem>>, vector<1x2xf32>
      tpu.vector_store %arg20[%c0_77, %c0_78], %151 {strides = array<i32>} : memref<6x2xf32, #tpu.memory_space<vmem>>, vector<1x2xf32>,
      %153 = vector.extract_strided_slice %118 {offsets = [1, 0], sizes = [1, 2], strides = [1, 1]} : vector<4x2xf32> to vector<1x2xf32>
      %cst_79 = arith.constant 9.99999993E-9 : f32
      %154 = vector.broadcast %cst_79 : f32 to vector<1x2xf32>
      %155 = arith.addf %153, %154 : vector<1x2xf32>
      %c1_80 = arith.constant 1 : index
      %c0_81 = arith.constant 0 : index
      %156 = vector.load %arg20[%c1_80, %c0_81] : memref<6x2xf32, #tpu.memory_space<vmem>>, vector<1x2xf32>
      tpu.vector_store %arg20[%c1_80, %c0_81], %155 {strides = array<i32>} : memref<6x2xf32, #tpu.memory_space<vmem>>, vector<1x2xf32>,
      %157 = vector.extract_strided_slice %118 {offsets = [2, 0], sizes = [1, 2], strides = [1, 1]} : vector<4x2xf32> to vector<1x2xf32>
      %158 = vector.extract_strided_slice %118 {offsets = [3, 0], sizes = [1, 2], strides = [1, 1]} : vector<4x2xf32> to vector<1x2xf32>
      %cst_82 = arith.constant 9.99999993E-9 : f32
      %159 = vector.broadcast %cst_82 : f32 to vector<1x2xf32>
      %160 = arith.addf %158, %159 : vector<1x2xf32>
      %161 = arith.divf %157, %160 : vector<1x2xf32>
      %c2 = arith.constant 2 : index
      %c0_83 = arith.constant 0 : index
      %162 = vector.load %arg20[%c2, %c0_83] : memref<6x2xf32, #tpu.memory_space<vmem>>, vector<1x2xf32>
      tpu.vector_store %arg20[%c2, %c0_83], %161 {strides = array<i32>} : memref<6x2xf32, #tpu.memory_space<vmem>>, vector<1x2xf32>,
      %163 = vector.extract_strided_slice %148 {offsets = [0, 0], sizes = [1, 2], strides = [1, 1]} : vector<4x2xf32> to vector<1x2xf32>
      %cst_84 = arith.constant 9.99999993E-9 : f32
      %164 = vector.broadcast %cst_84 : f32 to vector<1x2xf32>
      %165 = arith.addf %163, %164 : vector<1x2xf32>
      %c3 = arith.constant 3 : index
      %c0_85 = arith.constant 0 : index
      %166 = vector.load %arg20[%c3, %c0_85] : memref<6x2xf32, #tpu.memory_space<vmem>>, vector<1x2xf32>
      tpu.vector_store %arg20[%c3, %c0_85], %165 {strides = array<i32>} : memref<6x2xf32, #tpu.memory_space<vmem>>, vector<1x2xf32>,
      %167 = vector.extract_strided_slice %148 {offsets = [1, 0], sizes = [1, 2], strides = [1, 1]} : vector<4x2xf32> to vector<1x2xf32>
      %cst_86 = arith.constant 9.99999993E-9 : f32
      %168 = vector.broadcast %cst_86 : f32 to vector<1x2xf32>
      %169 = arith.addf %167, %168 : vector<1x2xf32>
      %c4 = arith.constant 4 : index
      %c0_87 = arith.constant 0 : index
      %170 = vector.load %arg20[%c4, %c0_87] : memref<6x2xf32, #tpu.memory_space<vmem>>, vector<1x2xf32>
      tpu.vector_store %arg20[%c4, %c0_87], %169 {strides = array<i32>} : memref<6x2xf32, #tpu.memory_space<vmem>>, vector<1x2xf32>,
      %171 = vector.extract_strided_slice %148 {offsets = [2, 0], sizes = [1, 2], strides = [1, 1]} : vector<4x2xf32> to vector<1x2xf32>
      %172 = vector.extract_strided_slice %148 {offsets = [3, 0], sizes = [1, 2], strides = [1, 1]} : vector<4x2xf32> to vector<1x2xf32>
      %cst_88 = arith.constant 9.99999993E-9 : f32
      %173 = vector.broadcast %cst_88 : f32 to vector<1x2xf32>
      %174 = arith.addf %172, %173 : vector<1x2xf32>
      %175 = arith.divf %171, %174 : vector<1x2xf32>
      %c5 = arith.constant 5 : index
      %c0_89 = arith.constant 0 : index
      %176 = vector.load %arg20[%c5, %c0_89] : memref<6x2xf32, #tpu.memory_space<vmem>>, vector<1x2xf32>
      tpu.vector_store %arg20[%c5, %c0_89], %175 {strides = array<i32>} : memref<6x2xf32, #tpu.memory_space<vmem>>, vector<1x2xf32>,
    } else {
    }
    return
  }
  func.func @transform_0(%arg0: i32) -> i32 {
    %c0_i32 = arith.constant 0 : i32
    %c0_i32_0 = arith.constant 0 : i32
    return %c0_i32 : i32
  }
  func.func @transform_1(%arg0: i32) -> i32 {
    %c0_i32 = arith.constant 0 : i32
    %c0_i32_0 = arith.constant 0 : i32
    return %c0_i32 : i32
  }
  func.func @transform_2(%arg0: i32) -> (i32, i32) {
    %c0_i32 = arith.constant 0 : i32
    %c0_i32_0 = arith.constant 0 : i32
    %c0_i32_1 = arith.constant 0 : i32
    return %c0_i32, %c0_i32_0 : i32, i32
  }
  func.func @transform_3(%arg0: i32) -> (i32, i32) {
    %c0_i32 = arith.constant 0 : i32
    %c0_i32_0 = arith.constant 0 : i32
    %c0_i32_1 = arith.constant 0 : i32
    return %c0_i32, %c0_i32_0 : i32, i32
  }
  func.func @transform_4(%arg0: i32) -> (i32, i32) {
    %c0_i32 = arith.constant 0 : i32
    %c0_i32_0 = arith.constant 0 : i32
    %c0_i32_1 = arith.constant 0 : i32
    return %c0_i32, %c0_i32_0 : i32, i32
  }
  func.func @transform_5(%arg0: i32) -> (i32, i32) {
    %c0_i32 = arith.constant 0 : i32
    %c0_i32_0 = arith.constant 0 : i32
    %c0_i32_1 = arith.constant 0 : i32
    return %c0_i32, %c0_i32_0 : i32, i32
  }
  func.func @transform_6(%arg0: i32) -> (i32, i32) {
    %c0_i32 = arith.constant 0 : i32
    %c0_i32_0 = arith.constant 0 : i32
    %c0_i32_1 = arith.constant 0 : i32
    return %c0_i32, %c0_i32_0 : i32, i32
  }
  func.func @transform_7(%arg0: i32) -> (i32, i32) {
    %c0_i32 = arith.constant 0 : i32
    %c0_i32_0 = arith.constant 0 : i32
    %c0_i32_1 = arith.constant 0 : i32
    return %c0_i32, %c0_i32_0 : i32, i32
  }
  func.func @transform_8(%arg0: i32) -> (i32, i32, i32) {
    %c0_i32 = arith.constant 0 : i32
    %c0_i32_0 = arith.constant 0 : i32
    %c0_i32_1 = arith.constant 0 : i32
    return %arg0, %c0_i32, %c0_i32_0 : i32, i32, i32
  }
  func.func @transform_9(%arg0: i32) -> (i32, i32, i32) {
    %c0_i32 = arith.constant 0 : i32
    %c0_i32_0 = arith.constant 0 : i32
    %c0_i32_1 = arith.constant 0 : i32
    return %arg0, %c0_i32, %c0_i32_0 : i32, i32, i32
  }
  func.func @transform_10(%arg0: i32) -> (i32, i32, i32) {
    %c0_i32 = arith.constant 0 : i32
    %c0_i32_0 = arith.constant 0 : i32
    %c0_i32_1 = arith.constant 0 : i32
    return %arg0, %c0_i32, %c0_i32_0 : i32, i32, i32
  }
  func.func @transform_11(%arg0: i32) -> (i32, i32, i32) {
    %c0_i32 = arith.constant 0 : i32
    %c0_i32_0 = arith.constant 0 : i32
    %c0_i32_1 = arith.constant 0 : i32
    return %arg0, %c0_i32, %c0_i32_0 : i32, i32, i32
  }
  func.func @transform_12(%arg0: i32) -> (i32, i32, i32) {
    %c0_i32 = arith.constant 0 : i32
    %c0_i32_0 = arith.constant 0 : i32
    %c0_i32_1 = arith.constant 0 : i32
    return %arg0, %c0_i32, %c0_i32_0 : i32, i32, i32
  }
  func.func @transform_13(%arg0: i32) -> (i32, i32, i32) {
    %c0_i32 = arith.constant 0 : i32
    %c0_i32_0 = arith.constant 0 : i32
    %c0_i32_1 = arith.constant 0 : i32
    return %arg0, %c0_i32, %c0_i32_0 : i32, i32, i32
  }
  func.func @transform_14(%arg0: i32) -> (i32, i32, i32) {
    %c0_i32 = arith.constant 0 : i32
    %c0_i32_0 = arith.constant 0 : i32
    %c0_i32_1 = arith.constant 0 : i32
    return %arg0, %c0_i32, %c0_i32_0 : i32, i32, i32
  }
  func.func @transform_15(%arg0: i32) -> (i32, i32, i32) {
    %c0_i32 = arith.constant 0 : i32
    %c0_i32_0 = arith.constant 0 : i32
    %c0_i32_1 = arith.constant 0 : i32
    return %arg0, %c0_i32, %c0_i32_0 : i32, i32, i32
  }
  func.func @transform_16(%arg0: i32) -> (i32, i32, i32) {
    %c0_i32 = arith.constant 0 : i32
    %c0_i32_0 = arith.constant 0 : i32
    %c0_i32_1 = arith.constant 0 : i32
    return %arg0, %c0_i32, %c0_i32_0 : i32, i32, i32
  }
  func.func @transform_17(%arg0: i32) -> (i32, i32) {
    %c0_i32 = arith.constant 0 : i32
    %c0_i32_0 = arith.constant 0 : i32
    %c0_i32_1 = arith.constant 0 : i32
    return %c0_i32, %c0_i32_0 : i32, i32
  }
  func.func @transform_18(%arg0: i32) -> (i32, i32) {
    %c0_i32 = arith.constant 0 : i32
    %c0_i32_0 = arith.constant 0 : i32
    %c0_i32_1 = arith.constant 0 : i32
    return %c0_i32, %c0_i32_0 : i32, i32
  }
  func.func @transform_19(%arg0: i32) -> (i32, i32) {
    %c0_i32 = arith.constant 0 : i32
    %c0_i32_0 = arith.constant 0 : i32
    %c0_i32_1 = arith.constant 0 : i32
    return %c0_i32, %c0_i32_0 : i32, i32
  }
}

</mosaic_0001>

<bundles_post_ra>
// kernel: graph_mol_masker_forward.1
= control target key start
LH: loop header
LB: loop body
LE: loop exit
PB: predicated region body
PF: predicated region fallthrough
CT: control target
= control target key end

     0   :  { %s2859_s0 = inlined_call_operand.vmem [shape: f32[2], index: 0, kind: input, shape index: {}]   ;;  %s2860_s1 = inlined_call_operand.vmem [shape: f32[2], index: 1, kind: input, shape index: {}]   ;;  %s2861_s2 = inlined_call_operand.vmem [shape: f32[16,32], index: 2, kind: input, shape index: {}]   ;;  %s2862_s3 = inlined_call_operand.vmem [shape: s32[32,1], index: 3, kind: input, shape index: {}]   ;;  %s2863_s4 = inlined_call_operand.vmem [shape: s32[32,1], index: 4, kind: input, shape index: {}]   ;;  %s2864_s5 = inlined_call_operand.vmem [shape: s32[16,1], index: 5, kind: input, shape index: {}]   ;;  %s2865_s6 = inlined_call_operand.vmem [shape: s32[32,1], index: 6, kind: input, shape index: {}]   ;;  %s2866_s7 = inlined_call_operand.vmem [shape: f32[3,32], index: 7, kind: input, shape index: {}]   ;;  %s2867_s8 = inlined_call_operand.vmem [shape: f32[2,32,32], index: 8, kind: input, shape index: {}]   ;;  %s2868_s9 = inlined_call_operand.vmem [shape: f32[2,32,64], index: 9, kind: input, shape index: {}]   ;;  %s2869_s10 = inlined_call_operand.vmem [shape: f32[2,1,64], index: 10, kind: input, shape index: {}]   ;;  %s2870_s11 = inlined_call_operand.vmem [shape: f32[2,1,64], index: 11, kind: input, shape index: {}]   ;;  %s2871_s12 = inlined_call_operand.vmem [shape: f32[2,1,64], index: 12, kind: input, shape index: {}]   ;;  %s2872_s13 = inlined_call_operand.vmem [shape: f32[2,64,32], index: 13, kind: input, shape index: {}]   ;;  %s2873_s14 = inlined_call_operand.vmem [shape: f32[2,1,32], index: 14, kind: input, shape index: {}]   ;;  %s2874_s15 = inlined_call_operand.vmem [shape: f32[2,1,32], index: 15, kind: input, shape index: {}]   ;;  %s2875_s16 = inlined_call_operand.vmem [shape: f32[2,1,32], index: 16, kind: input, shape index: {}]   ;;  %s2876_s17 = inlined_call_operand.hbm [shape: f32[1,16], index: 17, kind: output, shape index: {0}]   ;;  %s2877_s18 = inlined_call_operand.hbm [shape: f32[1,32], index: 18, kind: output, shape index: {1}]   ;;  %s2878_s19 = inlined_call_operand.vmem [shape: f32[6,2], index: 19, kind: output, shape index: {2}]  }
   0x1   :  { %2886 = sst [smem:[#allocation18_spill]] %s2859_s0 }
   0x2   :  { %2887 = sst [smem:[#allocation19_spill]] %s2860_s1 }
   0x3   :  { %2888 = sst [smem:[#allocation20_spill]] %s2861_s2 }
   0x4   :  { %2889 = sst [smem:[#allocation21_spill]] %s2862_s3 }
   0x5   :  { %2890 = sst [smem:[#allocation22_spill]] %s2865_s6 }
   0x6   :  { %2891 = sst [smem:[#allocation23_spill]] %s2867_s8 }
   0x7   :  { %2892 = sst [smem:[#allocation24_spill]] %s2876_s17 }
   0x8   :  { %2893 = sst [smem:[#allocation25_spill]] %s2877_s18 }
   0x9   :  { %2894 = sst [smem:[#allocation26_spill]] %s2878_s19 }
   0xa   :  { %25 = vsyncpa [#allocation7], 0 }
   0xb   :  { %26 = vsyncpa [#allocation9], 0 }
   0xc   :  { %27 = vsyncpa [#allocation6], 0 }
   0xd   :  { %28 = vsyncpa [#allocation12], 0  ;;  %s2486_s0 = smov 0  }
   0xe LB: > { %2895 = sst [smem:[#allocation17_spill]] %s2374_s0  ;;  %s2492_s30 = sadd.s32 4294967295, %s2374_s0   ;;  %s2374_s0 = sphi %s2486_s0, %s34_s0  }
   0xf   : > { %p1982_p0 = scmp.ge.s32.totalorder %s2374_s0, 1  ;;  %p504_p1 = scmp.lt.s32.totalorder %s2374_s0, 3 }
  0x10   : > { %s2896_s1 = sld [smem:[#allocation18_spill]]  ;;  %p2881_p4 = scmp.eq.s32.totalorder %s2492_s30, 0 }
  0x11   : > { %p2500_p3 = pnand %p1982_p0, %p504_p1  ;;  %s2898_s25 = sld [smem:[#allocation19_spill]] }
  0x13   : > { %s2897_s2 = scalar_select %p2500_p3, 1, 0 }
  0x14   : > { %p2224_p5 = pneg %p2500_p3 }
  0x16   : > { %s517_s22 = sshll.u32 %s2896_s1, 4  ;;  %p2512_p6 = pnand %p2881_p4, %p2224_p5  ;;  %s518_s22 = int_to_ptr.vmem [resolvable:$true] %s517_s22 }
  0x17   : > { %s528_s3 = sshll.u32 %s2898_s25, 4  ;;  %s2274_s27 = scalar_lea.vmem %s518_s22, 16  ;;  %s529_s3 = int_to_ptr.vmem [resolvable:$true] %s528_s3 }
  0x18   : > { %p2275_p7 = scmp.ne.s32.totalorder %s518_s22, %s2274_s27  ;;  %p2276_p8 = pneg %p2512_p6 }
  0x19   : > { %p2282_p11 = scmp.lt.s32.totalorder %s518_s22, %s518_s22  ;;  %p2283_p12 = scmp.lt.s32.totalorder %s2274_s27, %s2274_s27 }
  0x1a   : > { %p2277_p9 = pnand %p2276_p8, %p2275_p7 }
  0x1b   : > { %p2284_p13 = por %p2283_p12, %p2282_p11 }
  0x1c   : > { %p2278_p10 = pneg %p2277_p9 }
  0x1e   : > { %p2285_p0 = pnand %p2284_p13, %p2278_p10 }
  0x20   : > { %2288 = shalt.err (!%p2285_p0)
}
  0x21   : > { %s2376_s28 = smov [#allocation5]   ;;  %s2289_s29 = scalar_lea.vmem %s529_s3, 16 }
  0x22   : > { %2227 = dma.vmem_to_smem (!%p2512_p6), %s518_s22, 16, %s2376_s28, [#allocation7]  }
  0x23   : > { %p2290_p1 = scmp.ne.s32.totalorder %s529_s3, %s2289_s29  ;;  %p2297_p4 = scmp.lt.s32.totalorder %s529_s3, %s529_s3 }
  0x24   : > { %p2298_p3 = scmp.lt.s32.totalorder %s2289_s29, %s2289_s29 }
  0x25   : > { %p2292_p5 = pnand %p2290_p1, %p2276_p8 }
  0x26   : > { %p2299_p7 = por %p2298_p3, %p2297_p4 }
  0x27   : > { %p2293_p2 = pneg %p2292_p5 }
  0x29   : > { %p2300_p9 = pnand %p2299_p7, %p2293_p2 }
  0x2b   : > { %2303 = shalt.err (!%p2300_p9)
}
  0x2c   : > { %s2377_s20 = smov [#allocation8]   ;;  %p2900_p10 = scmp.ne.s32.totalorder %s2897_s2, 0 }
  0x2d   : > { %2230 = dma.vmem_to_smem (!%p2512_p6), %s529_s3, 16, %s2377_s20, [#allocation9]  }
  0x2e   : > { %619 = sbr.rel (%p2900_p10) target bundleno = 1725 (0x6bd), region = 88  ;;  %p2901_p11 = scmp.eq.s32.totalorder (!%p2900_p10), %s2492_s30, 0 }
  0x33   : > { %2357 = dma.done.wait (%p2901_p11), [#allocation7], 16   ;;  %p2902_p12 = pmov %p2901_p11 }
  0x34   : > { %p2903_p8 = pmov %p2901_p11 }
  0x35   : > { %2359 = vsyncadd (%p2902_p12), [#allocation7], 4294967280 }
  0x36   : > { %2361 = dma.done.wait (%p2903_p8), [#allocation9], 16   ;;  %p2904_p3 = pmov %p2903_p8 }
  0x38   : > { %2363 = vsyncadd (%p2904_p3), [#allocation9], 4294967280 }
  0x39   : > { %629 = sfence }
  0x3a   : > { %p703_p2 = scmp.lt.s32.totalorder %s2492_s30, 1  ;;  %s2905_s8 = sld [smem:[#allocation23_spill]] }
  0x3b   : > { %p2906_p4 = scmp.ne.s32.totalorder %s2492_s30, 0 }
  0x3c   : > { %s2534_s21 = scalar_select %p703_p2, %s2492_s30, 1 }
  0x3d   : > { %739 = sbr.rel (%p2906_p4) target bundleno = 207 (0xcf), region = 100  ;;  %s2907_s23 = sld [smem:[#allocation21_spill]] (!%p2906_p4) }
  0x3e   : > { %s2058_s1 = sshll.u32 %s2534_s21, 5  ;;  %s721_s19 = scalar_lea.vmem %s2871_s12, %s2534_s21 }
  0x3f   : > { %s2549_s28 = scalar_lea.vmem %s2868_s9, %s2058_s1  ;;  %s2060_s22 = sshll.u32 %s2534_s21, 6 }
  0x40   : > { %s2544_s3 = scalar_lea.vmem %s2905_s8, %s2058_s1  ;;  %s2567_s6 = scalar_lea.vmem %s2872_s13, %s2060_s22 }
  0x41   : > { %s732_s27 = scalar_lea.vmem %s2874_s15, %s2534_s21  ;;  %s735_s0 = scalar_lea.vmem %s2875_s16, %s2534_s21 }
  0x42   : > { %v2378_v2 = vmov 0   ;;  %v776_v5 = vld [vmem:[%s2863_s4 + $0x8] sm:$0xff]  ;;  %v775_v6 = vld [vmem:[%s2863_s4] sm:$0xff]  ;;  %v778_v7 = vld [vmem:[%s2863_s4 + $0x18] sm:$0xff]  ;;  %s2908_s1 = sld [smem:[#allocation20_spill]]  ;;  %vm809_vm0 = vcmask 261120   ;;  %v740_v11 = vlaneseq }
  0x43   : > { %v744_v0 = vld [vmem:[%s2907_s23 + $0x10] sm:$0xff]  ;;  %v742_v1 = vld [vmem:[%s2907_s23] sm:$0xff]  ;;  %2259 = vset.pattern.permute.xlu1 %v2378_v2  ;;  %2258 = vset.pattern.permute.xlu0 %v2378_v2  ;;  %v745_v3 = vld [vmem:[%s2907_s23 + $0x18] sm:$0xff]  ;;  %vm770_vm1 = vcmask 130048   ;;  %v2379_v15 = vmov 0.0  }
  0x44   : > { %753 = vperm.xlu1 %2259, %v744_v0   ;;  %747 = vperm.xlu0 %2258, %v742_v1   ;;  %v743_v4 = vld [vmem:[%s2907_s23 + $0x8] sm:$0xff]  ;;  %v777_v8 = vld [vmem:[%s2863_s4 + $0x10] sm:$0xff]  ;;  %v741_v12 = vand.u32 127, %v740_v11 }
  0x48   : > { %756 = vperm.xlu1 %2259, %v745_v3   ;;  %750 = vperm.xlu0 %2258, %v743_v4   ;;  %v807_v9 = vld [vmem:[%s2908_s1] sm:$0xff]  ;;  %v808_v10 = vld [vmem:[%s2908_s1 + $0x8] sm:$0xff] }
  0x49   : > { %810 = vst.msk [vmem:[#allocation4] sm:$0xff] %vm809_vm0, %v807_v9  ;;  %811 = vst.msk [vmem:[#allocation4 + $0x8] sm:$0xff] %vm809_vm0, %v808_v10 }
  0x4c   : > { %783 = vperm.xlu1 %2259, %v776_v5   ;;  %780 = vperm.xlu0 %2258, %v775_v6  }
  0x50   : > { %789 = vperm.xlu1 %2259, %v778_v7   ;;  %786 = vperm.xlu0 %2258, %v777_v8  }
  0xbf   : > { %v754_v13 = vpop.permute.xlu1 %753  ;;  %v748_v14 = vpop.permute.xlu0 %747 }
  0xc0   : > { %vm760_vm2 = vcmp.eq.s32.totalorder %v741_v12, %v754_v13  ;;  %vm758_vm3 = vcmp.eq.s32.totalorder %v741_v12, %v748_v14 }
  0xc1   : > { %v1998_v16 = vsel %vm760_vm2, 1.0, %v2379_v15  ;;  %v1996_v17 = vsel %vm758_vm3, 1.0, %v2379_v15 }
  0xc2   : > { %773 = vst.msk [vmem:[#allocation2 + $0x10] sm:$0xff] %vm770_vm1, %v1998_v16  ;;  %771 = vst.msk [vmem:[#allocation2] sm:$0xff] %vm770_vm1, %v1996_v17 }
  0xc3   : > { %v757_v18 = vpop.permute.xlu1 %756  ;;  %v751_v19 = vpop.permute.xlu0 %750 }
  0xc4   : > { %vm761_vm4 = vcmp.eq.s32.totalorder %v741_v12, %v757_v18  ;;  %vm759_vm5 = vcmp.eq.s32.totalorder %v741_v12, %v751_v19 }
  0xc5   : > { %v1999_v20 = vsel %vm761_vm4, 1.0, %v2379_v15  ;;  %v1997_v21 = vsel %vm759_vm5, 1.0, %v2379_v15 }
  0xc6   : > { %774 = vst.msk [vmem:[#allocation2 + $0x18] sm:$0xff] %vm770_vm1, %v1999_v20  ;;  %772 = vst.msk [vmem:[#allocation2 + $0x8] sm:$0xff] %vm770_vm1, %v1997_v21 }
  0xc7   : > { %v784_v22 = vpop.permute.xlu1 %783  ;;  %v781_v23 = vpop.permute.xlu0 %780 }
  0xc8   : > { %vm792_vm6 = vcmp.eq.s32.totalorder %v741_v12, %v784_v22  ;;  %vm791_vm7 = vcmp.eq.s32.totalorder %v741_v12, %v781_v23 }
  0xc9   : > { %v2001_v24 = vsel %vm792_vm6, 1.0, %v2379_v15  ;;  %v2000_v25 = vsel %vm791_vm7, 1.0, %v2379_v15 }
  0xca   : > { %804 = vst.msk [vmem:[#allocation3 + $0x8] sm:$0xff] %vm770_vm1, %v2001_v24  ;;  %803 = vst.msk [vmem:[#allocation3] sm:$0xff] %vm770_vm1, %v2000_v25 }
  0xcb   : > { %v790_v26 = vpop.permute.xlu1 %789  ;;  %v787_v27 = vpop.permute.xlu0 %786 }
  0xcc   : > { %vm794_vm8 = vcmp.eq.s32.totalorder %v741_v12, %v790_v26  ;;  %vm793_vm9 = vcmp.eq.s32.totalorder %v741_v12, %v787_v27 }
  0xcd   : > { %v2003_v28 = vsel %vm794_vm8, 1.0, %v2379_v15  ;;  %v2002_v29 = vsel %vm793_vm9, 1.0, %v2379_v15 }
  0xce   : > { %806 = vst.msk [vmem:[#allocation3 + $0x18] sm:$0xff] %vm770_vm1, %v2003_v28  ;;  %805 = vst.msk [vmem:[#allocation3 + $0x10] sm:$0xff] %vm770_vm1, %v2002_v29 }
  0xcf PF: > { %v2617_v30 = vld [vmem:[#allocation4 + $0x8] sm:$0xff]  ;;  %v2619_v31 = vld [vmem:[#allocation4] sm:$0xff]  ;;  %vm826_vm10 = vcmask 130048   ;;  %v2632_v35 = vld [vmem:[#allocation2 + $0x10] sm:$0xff]  ;;  %vm960_vm11 = vcmask 261120   ;;  %s2909_s20 = scalar_lea.vmem %s2869_s10, %s2534_s21  ;;  %s2910_s2 = scalar_lea.vmem %s2870_s11, %s2534_s21  ;;  %vm1175_vm12 = vcmask 523264  }
  0xd0   : > { %v2621_v32 = vld [vmem:[#allocation2] sm:$0xff]  ;;  %2110 = vmatprep.subr.mxu0 %v2617_v30  ;;  %v2627_v33 = vld [vmem:[#allocation2 + $0x8] sm:$0xff]  ;;  %v2642_v37 = vld [vmem:[#allocation2 + $0x18] sm:$0xff]  ;;  %s1275_s22 = sadd.s32 1, %s2492_s30  ;;  %s2911_s29 = scalar_lea.vmem %s2873_s14, %s2534_s21 }
  0xd1   : > { %2114 = vmatprep.mubr.msk.f32.mxu0 %vm826_vm10, %v2621_v32  ;;  %2111 = vmatpush3.msra.mxu0 %v2617_v30  ;;  %v2629_v34 = vld [vmem:[#allocation3] sm:$0xff]  ;;  %v2636_v36 = vld [vmem:[#allocation3 + $0x8] sm:$0xff]  ;;  %v825_v43 = vld [vmem:[%s2544_s3 + $0x18] sm:$0xff]  ;;  %p2020_p6 = scmp.ge.s32.totalorder %s1275_s22, 2 }
  0xd2   : > { %2112 = vmatprep.subr.mxu0 %v2619_v31  ;;  %928 = vxpose.xlu0.b32.start [1/4] (short) (narrow) %v2629_v34, 16  ;;  %v823_v44 = vld [vmem:[%s2544_s3 + $0x8] sm:$0xff]  ;;  %v824_v46 = vld [vmem:[%s2544_s3 + $0x10] sm:$0xff]  ;;  %v822_v48 = vld [vmem:[%s2544_s3] sm:$0xff]  ;;  %s1042_s3 = sld [smem:[#allocation5 + %s2492_s30]] }
  0xd3   : > { %2113 = vmatpush3.msra.mxu0 %v2619_v31  ;;  %v1051_v58 = vld [vmem:[%s2549_s28 + $0x18] sm:$0xff]  ;;  %v1050_v59 = vld [vmem:[%s2549_s28 + $0x10] sm:$0xff]  ;;  %v1049_v60 = vld [vmem:[%s2549_s28 + $0x8] sm:$0xff] }
  0xd4   : > { %2115 = vmatmul.mubr.msk.f32.vlgmr.msra.gmra.mxu0 %vm826_vm10, %v2627_v33  ;;  %v1048_v61 = vld [vmem:[%s2549_s28] sm:$0xff]  ;;  %v1167_v62 = vld [vmem:[%s2567_s6 + $0x38] sm:$0xff]  ;;  %v1166_v63 = vld [vmem:[%s2567_s6 + $0x30] sm:$0xff] }
  0xd5   : > { %2117 = vmatprep.mubr.msk.f32.mxu0 %vm826_vm10, %v2632_v35  ;;  %v2645_v38 = vld [vmem:[#allocation3 + $0x10] sm:$0xff]  ;;  %v2650_v39 = vld [vmem:[#allocation3 + $0x18] sm:$0xff]  ;;  %2142 = vmatprep.subr.mxu1 %v1167_v62  ;;  %v1165_v7 = vld [vmem:[%s2567_s6 + $0x28] sm:$0xff] }
  0xd6   : > { %929 = vxpose.xlu0.b32.cont [2/4] (short) (narrow) %v2636_v36, 16  ;;  %2143 = vmatpush3.msra.mxu1 %v1167_v62  ;;  %v1164_v8 = vld [vmem:[%s2567_s6 + $0x20] sm:$0xff]  ;;  %v1163_v9 = vld [vmem:[%s2567_s6 + $0x18] sm:$0xff]  ;;  %v1162_v10 = vld [vmem:[%s2567_s6 + $0x10] sm:$0xff] }
  0xd7   : > { %2144 = vmatprep.subr.mxu1 %v1166_v63  ;;  %v1161_v11 = vld [vmem:[%s2567_s6 + $0x8] sm:$0xff]  ;;  %v1160_v12 = vld [vmem:[%s2567_s6] sm:$0xff] }
  0xd8   : > { %2118 = vmatmul.mubr.msk.f32.gmra.mxu0 %vm826_vm10, %v2642_v37  ;;  %2145 = vmatpush3.msra.mxu1 %v1166_v63  ;;  %v1043_v0 = vstv %s1042_s3  ;;  %v2010_v13 = vld [vmem:[%s2909_s20] ss:$0 sm:$0xff] }
  0xd9   : > { %v1044_v1 = vmul.f32 %v1043_v0, %v2619_v31  ;;  %v1045_v3 = vmul.f32 %v1043_v0, %v2617_v30  ;;  %2146 = vmatprep.subr.mxu1 %v1165_v7  ;;  %v2013_v15 = vld [vmem:[%s2910_s2] ss:$0 sm:$0xff] }
  0xda   : > { %930 = vxpose.xlu0.b32.cont [3/4] (short) (narrow) %v2645_v38, 16  ;;  %2147 = vmatpush3.msra.mxu1 %v1165_v7  ;;  %v2014_v20 = vld [vmem:[%s721_s19] ss:$0 sm:$0xff] }
  0xdb   : > { %2148 = vmatprep.subr.mxu1 %v1164_v8  ;;  %v2015_v26 = vld [vmem:[%s2911_s29] ss:$0 sm:$0xff] }
  0xdc   : > { %2149 = vmatpush3.msra.mxu1 %v1164_v8  ;;  %v2018_v28 = vld [vmem:[%s732_s27] ss:$0 sm:$0xff] }
  0xdd   : > { %2150 = vmatprep.subr.mxu1 %v1163_v9 }
  0xde   : > { %931 = vxpose.xlu0.b32.end [4/4] (short) (narrow) %v2650_v39, 16  ;;  %2151 = vmatpush3.msra.mxu1 %v1163_v9 }
  0xdf   : > { %2152 = vmatprep.subr.mxu1 %v1162_v10 }
  0xe0   : > { %2153 = vmatpush3.msra.mxu1 %v1162_v10 }
  0xe1   : > { %2154 = vmatprep.subr.mxu1 %v1161_v11 }
  0xe2   : > { %2155 = vmatpush3.msra.mxu1 %v1161_v11 }
  0xe3   : > { %2156 = vmatprep.subr.mxu1 %v1160_v12 }
  0xe4   : > { %2157 = vmatpush3.msra.mxu1 %v1160_v12 }
 0x14e   : > { %v944_v40 = vpop.trf.xlu0 }
 0x14f   : > { %2128 = vmatprep.mubr.msk.f32.mxu0 %vm960_vm11, %v944_v40  ;;  %v2019_v40 = vld [vmem:[%s735_s0] ss:$0 sm:$0xff] }
 0x152   : > { %v945_v57 = vpop.trf.xlu0 }
 0x194   : > { %v2116_v41 = vpop.f32.mrf.mxu0 }
 0x195   : > { %v911_v50 = vadd.f32 %v2116_v41, %v823_v44 }
 0x196   : > { %v905_v42 = vpop.f32.mrf.mxu0 }
 0x197   : > { %v906_v53 = vadd.f32 %v905_v42, %v822_v48  ;;  %v925_v55 = vmax.f32 %v911_v50, 0.0 }
 0x198   : > { %v2119_v45 = vpop.f32.mrf.mxu0 }
 0x199   : > { %v921_v47 = vadd.f32 %v2119_v45, %v825_v43  ;;  %v924_v56 = vmax.f32 %v906_v53, 0.0 }
 0x19a   : > { %v915_v49 = vpop.f32.mrf.mxu0 }
 0x19b   : > { %v927_v51 = vmax.f32 %v921_v47, 0.0  ;;  %v916_v52 = vadd.f32 %v915_v49, %v824_v46 }
 0x19d   : > { %v926_v54 = vmax.f32 %v916_v52, 0.0  ;;  %2120 = vmatprep.subr.mxu0 %v927_v51 }
 0x19e   : > { %2121 = vmatpush3.msra.mxu0 %v927_v51 }
 0x19f   : > { %2122 = vmatprep.subr.mxu0 %v926_v54 }
 0x1a0   : > { %2123 = vmatpush3.msra.mxu0 %v926_v54 }
 0x1a1   : > { %2124 = vmatprep.subr.mxu0 %v925_v55 }
 0x1a2   : > { %2125 = vmatpush3.msra.mxu0 %v925_v55 }
 0x1a3   : > { %2126 = vmatprep.subr.mxu0 %v924_v56 }
 0x1a4   : > { %2127 = vmatpush3.msra.mxu0 %v924_v56 }
 0x1a5   : > { %2129 = vmatmul.mubr.msk.f32.vlgmr.msra.gmra.mxu0 %vm960_vm11, %v945_v57  ;;  %2131 = vmatprep.subr.mxu0 %v1051_v58 }
 0x1a6   : > { %2132 = vmatpush3.msra.mxu0 %v1051_v58 }
 0x1a7   : > { %2133 = vmatprep.subr.mxu0 %v1050_v59 }
 0x1a8   : > { %2134 = vmatpush3.msra.mxu0 %v1050_v59 }
 0x1a9   : > { %2135 = vmatprep.subr.mxu0 %v1049_v60 }
 0x1aa   : > { %2136 = vmatpush3.msra.mxu0 %v1049_v60 }
 0x1ab   : > { %2137 = vmatprep.subr.mxu0 %v1048_v61 }
 0x1ac   : > { %2138 = vmatpush3.msra.mxu0 %v1048_v61 }
 0x265   : > { %v2130_v2 = vpop.f32.mrf.mxu0 }
 0x266   : > { %v1047_v6 = vadd.f32 %v2130_v2, %v1045_v3 }
 0x267   : > { %v1033_v4 = vpop.f32.mrf.mxu0 }
 0x268   : > { %v1046_v5 = vadd.f32 %v1044_v1, %v1033_v4 }
 0x26a   : > { %2139 = vmatprep.mubr.msk.f32.mxu0 %vm960_vm11, %v1046_v5 }
 0x26b   : > { %2140 = vmatmul.mubr.msk.f32.vlgmr.msra.gmra.mxu0 %vm960_vm11, %v1047_v6 }
 0x32b   : > { %v2141_v14 = vpop.f32.mrf.mxu0 }
 0x32c   : > { %v1137_v16 = vadd.f32 %v2141_v14, %v2010_v13 }
 0x32d   : > { %v1131_v17 = vpop.f32.mrf.mxu0 }
 0x32e   : > { %v1148_v18 = vmul.f32 %v2013_v15, %v1137_v16  ;;  %v1132_v19 = vadd.f32 %v2010_v13, %v1131_v17 }
 0x330   : > { %v1147_v21 = vmul.f32 %v2013_v15, %v1132_v19  ;;  %v1157_v22 = vadd.f32 %v2014_v20, %v1148_v18 }
 0x332   : > { %v1156_v23 = vadd.f32 %v2014_v20, %v1147_v21  ;;  %v1159_v25 = vmax.f32 %v1157_v22, 0.0 }
 0x334   : > { %v1158_v24 = vmax.f32 %v1156_v23, 0.0 }
 0x336   : > { %2158 = vmatprep.mubr.msk.f32.mxu1 %vm1175_vm12, %v1158_v24 }
 0x337   : > { %2159 = vmatmul.mubr.msk.f32.vlgmr.msra.gmra.mxu1 %vm1175_vm12, %v1159_v25 }
 0x3f7   : > { %v2160_v27 = vpop.f32.mrf.mxu1 }
 0x3f8   : > { %v1254_v29 = vadd.f32 %v2160_v27, %v2015_v26 }
 0x3f9   : > { %v1248_v41 = vpop.f32.mrf.mxu1 }
 0x3fa   : > { %v1265_v42 = vmul.f32 %v2018_v28, %v1254_v29  ;;  %v1249_v43 = vadd.f32 %v2015_v26, %v1248_v41  ;;  %1279 = sbr.rel (%p2020_p6) target bundleno = 1029 (0x405), region = 104 }
 0x3fc   : > { %v1274_v44 = vadd.f32 %v2019_v40, %v1265_v42  ;;  %v1264_v45 = vmul.f32 %v2018_v28, %v1249_v43 }
 0x3fe   : > { %v1273_v46 = vadd.f32 %v2019_v40, %v1264_v45 }
 0x3ff   : > { %v1281_v48 = vmax.f32 %v1274_v44, 0.0 }
 0x400   : > { %v1280_v47 = vmax.f32 %v1273_v46, 0.0 }
 0x401   : > { %v1283_v50 = vadd.f32 %v1281_v48, %v2617_v30 }
 0x402   : > { %v1282_v49 = vadd.f32 %v1280_v47, %v2619_v31 }
 0x403   : > { %1285 = vst.msk [vmem:[#allocation4 + $0x8] sm:$0xff] %vm960_vm11, %v1283_v50 }
 0x404   : > { %1284 = vst.msk [vmem:[#allocation4] sm:$0xff] %vm960_vm11, %v1282_v49 }
 0x405 PF: > { %p2021_p13 = scmp.ne.s32.totalorder %s1275_s22, 2 }
 0x406   : > { %s2912_s8 = sld [smem:[#allocation22_spill]] (!%p2021_p13) }
 0x407   : > { %1289 = sbr.rel (%p2021_p13) target bundleno = 1692 (0x69c), region = 108  ;;  %s1292_s19 = sld [smem:[#allocation8]] (!%p2021_p13) }
 0x408   : > { %s2022_s24 = sld [smem:[#allocation8 + $0x1]] (!%p2021_p13) }
 0x409   : > { %s2913_s27 = sld [smem:[#allocation26_spill]] (!%p2021_p13) }
 0x40c   : > { %v1291_v51 = vadd.f32 %v1274_v44, %v2617_v30  ;;  %v1554_v52 = vld [vmem:[%s2864_s5 + $0x8] sm:$0xff]  ;;  %v2380_v53 = vmov 0.0   ;;  %vm2381_vm13 = vmmov 0   ;;  %v1290_v54 = vadd.f32 %v1273_v46, %v2619_v31  ;;  %v1553_v30 = vld [vmem:[%s2864_s5] sm:$0xff] }
 0x40d   : > { %2161 = vmatprep.subr.mxu0 %v2380_v53  ;;  %2165 = vmatprep.mubr.msk.f32.mxu0 %vm2381_vm13, %v2380_v53  ;;  %v2382_v55 = vmov 0   ;;  %v1294_v31 = vld [vmem:[%s2866_s7] sm:$0x7]  ;;  %v2383_v63 = vmov 1.0   ;;  %vm1549_vm0 = vcmask 122880   ;;  %vm1551_vm9 = vcmask 253952  }
 0x40e   : > { %2162 = vmatpush3.xpose.msk.msra.mxu0 %vm960_vm11, %v1291_v51  ;;  %2260 = vset.pattern.permute.xlu0 %v2382_v55  ;;  %v1541_v20 = vstv %s2022_s24  ;;  %vm1787_vm12 = vcmask 8192  }
 0x40f   : > { %2163 = vmatprep.subr.mxu0 %v2380_v53  ;;  %1561 = vperm.xlu0 %2260, %v1554_v52  }
 0x410   : > { %2168 = vmatprep.subr.mxu1 %v2380_v53  ;;  %2176 = vmatprep.mubr.msk.f32.mxu1 %vm2381_vm13, %v2380_v53 }
 0x411   : > { %2169 = vmatpush3.xpose.msk.msra.mxu1 %vm826_vm10, %v2650_v39  ;;  %2261 = vset.pattern.permute.xlu1 %v2382_v55  ;;  %v1374_v39 = vstv %s1292_s19 }
 0x412   : > { %2164 = vmatpush3.xpose.msk.msra.mxu0 %vm960_vm11, %v1290_v54  ;;  %2170 = vmatprep.subr.mxu1 %v2380_v53 }
 0x413   : > { %1558 = vperm.xlu0 %2260, %v1553_v30   ;;  %2179 = vmatprep.subr.mxu0 %v2380_v53 }
 0x415   : > { %2166 = vmatmul.mubr.msk.f32.vlgmr.msra.gmra.mxu0 %vm960_vm11, %v1294_v31  ;;  %2171 = vmatpush3.xpose.msk.msra.mxu1 %vm826_vm10, %v2645_v38 }
 0x416   : > { %2180 = vmatpush3.xpose.msk.msra.mxu0 %vm826_vm10, %v2642_v37  ;;  %2172 = vmatprep.subr.mxu1 %v2380_v53  ;;  %v1555_v37 = vlaneseq }
 0x417   : > { %2181 = vmatprep.subr.mxu0 %v2380_v53  ;;  %2187 = vmatprep.mubr.msk.f32.mxu0 %vm2381_vm13, %v2380_v53 }
 0x418   : > { %v1556_v38 = vand.u32 127, %v1555_v37  ;;  %v2776_v3 = vshrl.u32 %v1555_v37, 7 }
 0x419   : > { %2173 = vmatpush3.xpose.msk.msra.mxu1 %vm826_vm10, %v2636_v36  ;;  %v1667_v36 = vld [vmem:[%s2912_s8 + $0x8] sm:$0xff] }
 0x41a   : > { %2182 = vmatpush3.xpose.msk.msra.mxu0 %vm826_vm10, %v2632_v35  ;;  %2174 = vmatprep.subr.mxu1 %v2380_v53  ;;  %v1669_v35 = vld [vmem:[%s2912_s8 + $0x18] sm:$0xff]  ;;  %v2779_v6 = vsub.s32 0, %v2776_v3  ;;  %vm1577_vm2 = vcmp.eq.s32.totalorder %v2776_v3, 2  ;;  %vm1575_vm3 = vcmp.eq.s32.totalorder %v2776_v3, 1  ;;  %vm1574_vm4 = vcmp.eq.s32.totalorder %v2776_v3, 0 }
 0x41b   : > { %2183 = vmatprep.subr.mxu0 %v2380_v53  ;;  %1680 = vperm.xlu1 %2261, %v1669_v35  }
 0x41c   : > { %1674 = vperm.xlu0 %2260, %v1667_v36  }
 0x41d   : > { %2175 = vmatpush3.xpose.msk.msra.mxu1 %vm826_vm10, %v2629_v34  ;;  %v1666_v34 = vld [vmem:[%s2912_s8] sm:$0xff] }
 0x41e   : > { %2184 = vmatpush3.xpose.msk.msra.mxu0 %vm826_vm10, %v2627_v33  ;;  %2190 = vmatprep.subr.mxu1 %v2380_v53  ;;  %v1668_v33 = vld [vmem:[%s2912_s8 + $0x10] sm:$0xff] }
 0x41f   : > { %2185 = vmatprep.subr.mxu0 %v2380_v53  ;;  %1677 = vperm.xlu1 %2261, %v1668_v33  }
 0x422   : > { %2186 = vmatpush3.xpose.msk.msra.mxu0 %vm826_vm10, %v2621_v32 }
 0x423   : > { %1671 = vperm.xlu1 %2261, %v1666_v34  }
 0x48a   : > { %v1562_v32 = vpop.permute.xlu0 %1561 }
 0x48b   : > { %vm1564_vm14 = vcmp.eq.s32.totalorder %v1556_v38, %v1562_v32 }
 0x48e   : > { %v1559_v57 = vpop.permute.xlu0 %1558 }
 0x48f   : > { %vm1563_vm15 = vcmp.eq.s32.totalorder %v1556_v38, %v1559_v57 }
 0x496   : > { %v1681_v14 = vpop.permute.xlu1 %1680 }
 0x497   : > { %vm1685_vm5 = vcmp.eq.s32.totalorder %v1556_v38, %v1681_v14  ;;  %v1675_v16 = vpop.permute.xlu0 %1674 }
 0x498   : > { %vm1683_vm7 = vcmp.eq.s32.totalorder %v1556_v38, %v1675_v16 }
 0x49a   : > { %v1678_v15 = vpop.permute.xlu1 %1677 }
 0x49b   : > { %vm1684_vm6 = vcmp.eq.s32.totalorder %v1556_v38, %v1678_v15 }
 0x49e   : > { %v1672_v17 = vpop.permute.xlu1 %1671 }
 0x49f   : > { %vm1682_vm8 = vcmp.eq.s32.totalorder %v1556_v38, %v1672_v17 }
 0x4d5   : > { %v1370_v56 = vpop.f32.mrf.mxu0 }
 0x4d6   : > { %v1375_v58 = vadd.f32 %v1374_v39, %v1370_v56  ;;  %v1383_v59 = vrot.slane %v1370_v56, 2  ;;  %v1468_v60 = vrot.slane %v1370_v56, 1 }
 0x4d7   : > { %v2167_v61 = vpop.f32.mrf.mxu0 }
 0x4d8   : > { %v1376_v62 = vsub.f32 0.0, %v1375_v58  ;;  %2177 = vmatmul.mubr.msk.f32.vlgmr.msra.gmra.mxu1 %vm826_vm10, %v1383_v59  ;;  %2188 = vmatmul.mubr.msk.f32.vlgmr.msra.gmra.mxu0 %vm826_vm10, %v1468_v60 }
 0x4d9   : > { %2191 = vmatpush3.msk.msra.mxu1 %vm1564_vm14, %v2383_v63  ;;  %2194 = vmatprep.mubr.msk.f32.mxu1 %vm2381_vm13, %v2380_v53  ;;  %vm1796_vm14 = vcmask 10242  }
 0x4da   : > { %v1377_v0 = vmul.f32 1.442695, %v1376_v62  ;;  %2192 = vmatprep.subr.mxu1 %v2380_v53 }
 0x4db   : > { %2193 = vmatpush3.msk.msra.mxu1 %vm1563_vm15, %v2383_v63 }
 0x4dc   : > { %2262 = vpow2.f32 %v1377_v0  ;;  %2197 = vmatprep.subr.mxu1 %v2380_v53 }
 0x4e9   : > { %v2263_v1 = vpop.eup %2262 }
 0x4ea   : > { %v1379_v2 = vadd.f32 1.0, %v2263_v1 }
 0x4ec   : > { %2264 = vrcp.f32 %v1379_v2 }
 0x4f9   : > { %v2265_v4 = vpop.eup %2264 }
 0x4fa   : > { %1550 = vst.msk [vmem:[#allocation10] sm:$0x1] %vm1549_vm0, %v2265_v4  ;;  %vm1571_vm1 = vcmp.gt.f32.partialorder %v2265_v4, 0.0  ;;  %v1576_v5 = vsub.f32 1.0, %v2265_v4  ;;  %v1591_v11 = vrot.slane %v2265_v4, %v2779_v6 }
 0x4fb   : > { %v2038_v7 = vsel %vm1571_vm1, 1.0, %v2380_v53 }
 0x4fc   : > { %v1581_v8 = vrot.slane %v2038_v7, %v2779_v6  ;;  %v1586_v9 = vrot.slane %v1576_v5, %v2779_v6 }
 0x4fe   : > { %v1582_v10 = vsel %vm1577_vm2, %v1581_v8, 1.0 }
 0x4ff   : > { %v1587_v12 = vsel %vm1575_vm3, %v1586_v9, %v1582_v10 }
 0x500   : > { %v1592_v13 = vsel %vm1574_vm4, %v1591_v11, %v1587_v12 }
 0x501   : > { %2195 = vmatmul.mubr.msk.f32.vlgmr.msra.gmra.mxu1 %vm826_vm10, %v1592_v13 }
 0x502   : > { %2205 = vmatprep.mubr.msk.f32.mxu1 %vm2381_vm13, %v2380_v53  ;;  %2198 = vmatpush3.msk.msra.mxu1 %vm1685_vm5, %v2383_v63  ;;  %vm1789_vm13 = vcmask 9217  }
 0x503   : > { %2199 = vmatprep.subr.mxu1 %v2380_v53 }
 0x504   : > { %2200 = vmatpush3.msk.msra.mxu1 %vm1684_vm6, %v2383_v63 }
 0x505   : > { %2201 = vmatprep.subr.mxu1 %v2380_v53 }
 0x506   : > { %2202 = vmatpush3.msk.msra.mxu1 %vm1683_vm7, %v2383_v63 }
 0x507   : > { %2203 = vmatprep.subr.mxu1 %v2380_v53 }
 0x508   : > { %2204 = vmatpush3.msk.msra.mxu1 %vm1682_vm8, %v2383_v63 }
 0x598   : > { %v1464_v18 = vpop.f32.mrf.mxu1  ;;  %v1537_v19 = vpop.f32.mrf.mxu0 }
 0x599   : > { %v1538_v21 = vadd.f32 %v1537_v19, %v1464_v18 }
 0x59a   : > { %v2178_v22 = vpop.f32.mrf.mxu1  ;;  %v2189_v23 = vpop.f32.mrf.mxu0 }
 0x59b   : > { %v1542_v24 = vadd.f32 %v1541_v20, %v1538_v21 }
 0x59d   : > { %v1543_v25 = vsub.f32 0.0, %v1542_v24 }
 0x59f   : > { %v1544_v26 = vmul.f32 1.442695, %v1543_v25 }
 0x5a1   : > { %2266 = vpow2.f32 %v1544_v26 }
 0x5ae   : > { %v2267_v27 = vpop.eup %2266 }
 0x5af   : > { %v1546_v28 = vadd.f32 1.0, %v2267_v27 }
 0x5b1   : > { %2268 = vrcp.f32 %v1546_v28 }
 0x5be   : > { %v2269_v29 = vpop.eup %2268 }
 0x5bf   : > { %1552 = vst.msk [vmem:[#allocation11] sm:$0x1] %vm1551_vm9, %v2269_v29  ;;  %vm1694_vm10 = vcmp.gt.f32.partialorder %v2269_v29, 0.0  ;;  %v1697_v40 = vsub.f32 1.0, %v2269_v29  ;;  %v1711_v48 = vrot.slane %v2269_v29, %v2779_v6 }
 0x5c0   : > { %v2046_v41 = vsel %vm1694_vm10, 1.0, %v2380_v53 }
 0x5c1   : > { %v1662_v42 = vpop.f32.mrf.mxu1  ;;  %v1701_v43 = vrot.slane %v2046_v41, %v2779_v6  ;;  %v1706_v44 = vrot.slane %v1697_v40, %v2779_v6 }
 0x5c2   : > { %v1786_v45 = vadd.f32 1e-08, %v1662_v42 }
 0x5c3   : > { %v2196_v46 = vpop.f32.mrf.mxu1  ;;  %v1702_v47 = vsel %vm1577_vm2, %v1701_v43, 1.0 }
 0x5c4   : > { %1788 = vst.msk [vmem:[%s2913_s27] sm:$0x1] %vm1787_vm12, %v1786_v45  ;;  %v1792_v49 = vrot.slane %v1786_v45, 1  ;;  %v1707_v50 = vsel %vm1575_vm3, %v1706_v44, %v1702_v47 }
 0x5c5   : > { %1790 = vst.msk [vmem:[%s2913_s27] sm:$0x2] %vm1789_vm13, %v1786_v45  ;;  %v1712_v51 = vsel %vm1574_vm4, %v1711_v48, %v1707_v50 }
 0x5c6   : > { %2270 = vrcp.f32 %v1792_v49  ;;  %2206 = vmatmul.mubr.msk.f32.vlgmr.msra.gmra.mxu1 %vm960_vm11, %v1712_v51 }
 0x5d3   : > { %v2271_v52 = vpop.eup %2270 }
 0x5d4   : > { %v1795_v53 = vmul.f32 %v2271_v52, %v1662_v42 }
 0x5d6   : > { %1797 = vst.msk [vmem:[%s2913_s27] sm:$0x4] %vm1796_vm14, %v1795_v53 }
 0x686   : > { %v1782_v54 = vpop.f32.mrf.mxu1 }
 0x687   : > { %v1798_v55 = vadd.f32 1e-08, %v1782_v54 }
 0x688   : > { %v2207_v30 = vpop.f32.mrf.mxu1 }
 0x689   : > { %1799 = vst.msk [vmem:[%s2913_s27 + $0x3] sm:$0x1] %vm1787_vm12, %v1798_v55  ;;  %v1802_v31 = vrot.slane %v1798_v55, 1 }
 0x68a   : > { %1800 = vst.msk [vmem:[%s2913_s27 + $0x3] sm:$0x2] %vm1789_vm13, %v1798_v55 }
 0x68b   : > { %2272 = vrcp.f32 %v1802_v31 }
 0x698   : > { %v2273_v35 = vpop.eup %2272 }
 0x699   : > { %v1805_v36 = vmul.f32 %v2273_v35, %v1782_v54 }
 0x69b   : > { %1806 = vst.msk [vmem:[%s2913_s27 + $0x3] sm:$0x4] %vm1796_vm14, %v1805_v36 }
 0x69c PF: > { %p2235_p0 = scmp.eq.s32.totalorder %s2492_s30, 1  ;;  %s2384_s28 = smov [#allocation10]  }
 0x69d   : > { %s1814_s19 = sshll.u32 %s2384_s28, 4  ;;  %s2385_s24 = smov [#allocation11]   ;;  %s1815_s19 = int_to_ptr.vmem [resolvable:$true] %s1814_s19 }
 0x69e   : > { %s1825_s0 = sshll.u32 %s2385_s24, 4  ;;  %s2304_s21 = scalar_lea.vmem %s1815_s19, 16  ;;  %s1826_s0 = int_to_ptr.vmem [resolvable:$true] %s1825_s0 }
 0x69f   : > { %p2305_p1 = scmp.ne.s32.totalorder %s1815_s19, %s2304_s21  ;;  %s2310_s20 = scalar_lea.vmem %s1815_s19, 32 }
 0x6a0   : > { %p2311_p9 = scmp.lt.s32.totalorder %s1815_s19, %s1815_s19  ;;  %p2312_p10 = scmp.lt.s32.totalorder %s2310_s20, %s2304_s21 }
 0x6a1   : > { %p2306_p5 = pnand %p2305_p1, %p2235_p0 }
 0x6a2   : > { %p2313_p11 = por %p2312_p10, %p2311_p9 }
 0x6a3   : > { %p2307_p7 = pneg %p2306_p5 }
 0x6a5   : > { %p2314_p12 = pnand %p2313_p11, %p2307_p7 }
 0x6a7   : > { %2317 = shalt.err (!%p2314_p12)
}
 0x6a8   : > { %s2914_s2 = sld [smem:[#allocation24_spill]]  ;;  %s2328_s6 = scalar_lea.vmem %s1826_s0, 16 }
 0x6a9   : > { %p2329_p8 = scmp.ne.s32.totalorder %s1826_s0, %s2328_s6  ;;  %s2334_s22 = scalar_lea.vmem %s1826_s0, 32 }
 0x6aa   : > { %p2335_p4 = scmp.lt.s32.totalorder %s1826_s0, %s1826_s0  ;;  %p2336_p6 = scmp.lt.s32.totalorder %s2334_s22, %s2328_s6 }
 0x6ab   : > { %p2330_p3 = pnand %p2329_p8, %p2235_p0 }
 0x6ac   : > { %p2337_p13 = por %p2336_p6, %p2335_p4 }
 0x6ad   : > { %p2331_p2 = pneg %p2330_p3 }
 0x6ae   : > { %2217 = dma.vmem_to_hbm [thread:$0]  (%p2235_p0), %s1815_s19, 16, %s2914_s2, [#allocation6]  }
 0x6af   : > { %p2338_p1 = pnand %p2337_p13, %p2331_p2 }
 0x6b1   : > { %2341 = shalt.err (!%p2338_p1)
}
 0x6b2   : > { %s2915_s29 = sld [smem:[#allocation25_spill]] }
 0x6b8   : > { %2219 = dma.vmem_to_hbm [thread:$0]  (%p2235_p0), %s1826_s0, 16, %s2915_s29, [#allocation12]  }
 0x6b9   : > { %2365 = dma.done.wait (%p2235_p0), [#allocation6], 16  }
 0x6ba   : > { %2367 = vsyncadd (%p2235_p0), [#allocation6], 4294967280 }
 0x6bb   : > { %2369 = dma.done.wait (%p2235_p0), [#allocation12], 16  }
 0x6bc   : > { %2371 = vsyncadd (%p2235_p0), [#allocation12], 4294967280 }
 0x6bd PF: > { %s2916_s3 = sld [smem:[#allocation17_spill]] }
 0x6c3   : > { %s34_s0 = sadd.s32 1, %s2916_s3  }
 0x6c4   : > { %p31_p5 = scmp.ge.s32.totalorder %s34_s0, 4  }
 0x6c6   :  { %33 = sbr.rel (!%p31_p5) target bundleno = 14 (0xe), region = 176 }
 0x6cb   :  { %1848 = vsyncpa [#allocation6], 1 }
 0x6cc   :  { %1850 = vsyncpa [#allocation6 + $0x1], 1 }
 0x6cd   :  { %1851 = vsyncpa [#allocation12], 1 }
 0x6ce   :  { %1852 = vsyncpa [#allocation7], 1 }
 0x6cf   :  { %1854 = vsyncpa [#allocation7 + $0x1], 1 }
 0x6d0   :  { %1855 = vsyncpa [#allocation9], 1 }

</bundles_post_ra>
